<compile_context>
chip_gen: v7x
topology: tpu7x:2x2x1
jax: 0.10.0
libtpu: 0.0.40
codegen_flags: <defaults>
</compile_context>

<pallas_src>
import functools

import jax
import jax.numpy as jnp
from jax import lax
from jax.experimental import pallas as pl
from jax.experimental.pallas import tpu as pltpu

# ------------------------------ configuration --------------------------------
LATENT = 32            # latent_size
HIDDEN = 32            # mlp_hidden_size
MLP_LAYERS = 2         # mlp_layers
NUM_MP_STEPS = 2       # num_message_passing_steps (small for the demo)
USE_FACE = False       # faces disabled for this synthetic instantiation
PRED_POS_RESIDUAL = False   # module default
# eval mode: dropout / dropedge / dropnode / encoder_dropout are identity.

_VMEM = pl.BlockSpec(memory_space=pltpu.MemorySpace.VMEM)
_BF16 = jnp.bfloat16
_F32 = jnp.float32


# ------------------------------ in-kernel helpers ------------------------------
def _dot(a, b):
    return jnp.dot(a, b, preferred_element_type=jnp.float32)


def _mlp_bf16(parts, w_refs, chunk):
    """Fused Linear(+ReLU) chain.

    The first layer consumes `parts` (list of (M, chunk) fp32 values) as partial
    dots against `chunk`-row slices of W0, so the concatenated MLP input is never
    materialized.  MXU operands are bf16, accumulation fp32, elementwise fp32.
    """
    w0v = w_refs[0][...]
    h = w_refs[1][...].astype(_F32)
    for k, p in enumerate(parts):
        h = h + _dot(p.astype(_BF16), w0v[k * chunk:(k + 1) * chunk, :])
    n_layers = len(w_refs) // 2
    for i in range(1, n_layers):
        # TODO(synk): MLPwithselfBN source not provided; ReLU between layers,
        # no activation/BN/LN on the output (use_bn=use_layer_norm=False here).
        h = jnp.maximum(h, 0.0)
        h = _dot(h.astype(_BF16), w_refs[2 * i][...]) + w_refs[2 * i + 1][...]
    return h


# ------------------------------ fused whole-forward kernel ---------------------
def _gn_forward_kernel(layer_has_global, *refs):
    n_out = 3 + len(layer_has_global)
    in_refs = refs[:-n_out]
    out_refs = refs[-n_out:]

    (src_ref, dst_ref, nb_ref, eb_ref,
     x_ref, e_ref, u_ref, pos_ref, lp_ref, mask_ref) = in_refs[:10]
    w = list(in_refs[10:])
    x_out, e_out, u_out = out_refs[:3]
    pp_outs = out_refs[3:]

    # weight layout: pos-embed node (2), pos-embed edge (2), pos decoder (4),
    # then per step: edge MLP (6), node MLP (6), [global MLP (6) if present].
    pen_w, pen_b, pee_w, pee_b = w[0:4]
    dw = w[4:8]
    layers = []
    off = 8
    for hg in layer_has_global:
        ew = w[off:off + 6]; off += 6
        nw = w[off:off + 6]; off += 6
        gw = None
        if hg:
            gw = w[off:off + 6]; off += 6
        layers.append((ew, nw, gw))

    n, latent = x_ref.shape
    e = e_ref.shape[0]
    g = u_ref.shape[0]

    x = x_ref[...]
    edge_attr = e_ref[...]
    u = u_ref[...]
    pos = pos_ref[...]
    last_pred = lp_ref[...]
    mask = mask_ref[...]                                     # (n, 1) in {0, 1}

    # ---- one-hot incidence matrices (fp32, exact) — built ONCE, reused by all steps
    oh_src = (lax.broadcasted_iota(jnp.int32, (n, e), 0) == src_ref[...]).astype(_F32)
    oh_dst = (lax.broadcasted_iota(jnp.int32, (n, e), 0) == dst_ref[...]).astype(_F32)
    oh_nb = (lax.broadcasted_iota(jnp.int32, (g, n), 0) == nb_ref[...]).astype(_F32)
    oh_eb = (lax.broadcasted_iota(jnp.int32, (g, e), 0) == eb_ref[...]).astype(_F32)
    # gather orientation: one in-VMEM transpose each, reused by every gather/step
    oh_src_g = oh_src.T      # (e, n)
    oh_dst_g = oh_dst.T      # (e, n)
    oh_nb_g = oh_nb.T        # (n, g)
    oh_eb_g = oh_eb.T        # (e, g)
    counts = jnp.sum(oh_nb, axis=1, keepdims=True)           # (g, 1) node counts
    inv_counts = 1.0 / jnp.maximum(counts, 1.0)               # hoisted out of loop

    for step, (ew, nw, gw) in enumerate(layers):
        # ---- pos_embedding stand-in -------------------------------------------
        # TODO(synk): original `pos_embedding` module source not provided; embed
        # (masked) node coordinates and squared edge distances, matching the
        # (extended_x, extended_edge_attr) interface used by GNBlock.forward.
        pe_in = mask * last_pred + (1.0 - mask) * pos
        ext_x = x + _dot(pe_in, pen_w[...]) + pen_b[...]
        p_diff = _dot(oh_src_g - oh_dst_g, pe_in)            # p_src - p_dst, one matmul
        dist2 = jnp.sum(p_diff * p_diff, axis=1, keepdims=True)   # (e, 1)
        ext_e = edge_attr + dist2 * pee_w[...] + pee_b[...]  # K=1 linear as VPU broadcast

        # ---- edge model: MLP([x_src, x_dst, edge_attr, u[edge_batch]]) ---------
        x_src = _dot(oh_src_g, ext_x)
        x_dst = _dot(oh_dst_g, ext_x)
        u_e = _dot(oh_eb_g, u)
        e_new = _mlp_bf16([x_src, x_dst, ext_e, u_e], ew, latent)

        # ---- node model: MLP([x, sum_sent, sum_received, u[node_batch]]) -------
        sent = _dot(oh_src, e_new)          # e_new read once for both segment-sums
        recv = _dot(oh_dst, e_new)
        u_n = _dot(oh_nb_g, u)
        x_new = _mlp_bf16([ext_x, sent, recv, u_n], nw, latent)

        # ---- global model: MLP([u, sum_nodes, sum_edges]) (None on last step) --
        if gw is not None:
            n_agg = _dot(oh_nb, x_new)
            e_agg = _dot(oh_eb, e_new)
            u_new = _mlp_bf16([u, n_agg, e_agg], gw, latent)
        else:
            u_new = u                        # MetaLayer returns u unchanged
        u = u_new + u                        # residual (eval: dropout == identity)

        # ---- residuals (use the pre-pos-embed x / edge_attr, as in the module) -
        x = x_new + x
        edge_attr = e_new + edge_attr

        # ---- pos_decoder (MLPwoLastAct) + move2origin, fused --------------------
        pred = _mlp_bf16([x], dw, latent)                    # (n, 3)
        if PRED_POS_RESIDUAL:
            pred = last_pred + pred
        means = _dot(oh_nb, pred) * inv_counts               # (g, 3) per-graph mean
        last_pred = pred - _dot(oh_nb_g, means)              # scatter means back
        pp_outs[step][...] = last_pred

    x_out[...] = x
    e_out[...] = edge_attr
    u_out[...] = u


# ------------------------------ wrapper ----------------------------------------
def _flatten_mlp(mlp_params):
    flat = []
    for wt, b in mlp_params:
        flat.extend([wt, b])
    return flat


def gnblock_apply(params, x, edge_attr, u, pos, last_pred, mask_f,
                  src_row, dst_row, nb_row, eb_row):
    """Whole GNBlock forward == one pallas_call."""
    n, latent = x.shape
    e = edge_attr.shape[0]
    g = u.shape[0]
    layer_has_global = tuple(lp["global"] is not None for lp in params["layers"])

    weights = (_flatten_mlp(params["pos_embed_node"])
               + _flatten_mlp(params["pos_embed_edge"])
               + _flatten_mlp(params["pos_decoder"]))
    for lp in params["layers"]:
        weights += _flatten_mlp(lp["edge"]) + _flatten_mlp(lp["node"])
        if lp["global"] is not None:
            weights += _flatten_mlp(lp["global"])

    inputs = [src_row, dst_row, nb_row, eb_row,
              x, edge_attr, u, pos, last_pred, mask_f] + weights
    out_shape = tuple(
        [jax.ShapeDtypeStruct((n, latent), jnp.float32),
         jax.ShapeDtypeStruct((e, latent), jnp.float32),
         jax.ShapeDtypeStruct((g, latent), jnp.float32)]
        + [jax.ShapeDtypeStruct((n, 3), jnp.float32)] * len(layer_has_global))

    # TODO(synk): for large graphs add a row grid over edges/nodes (accumulating
    # the one-hot contractions across grid steps) so tiles fit v7x's 64 MiB VMEM
    # and shard across TensorCores; at these demo sizes one program is optimal.
    outs = pl.pallas_call(
        functools.partial(_gn_forward_kernel, layer_has_global),
        out_shape=out_shape,
        in_specs=[_VMEM] * len(inputs),
        out_specs=(_VMEM,) * len(out_shape),
        compiler_params=pltpu.CompilerParams(vmem_limit_bytes=32 * 1024 * 1024),
    )(*inputs)
    x_out, e_out, u_out = outs[:3]
    pos_predictions = list(outs[3:])
    return x_out, e_out, u_out, pos_predictions


# ------------------------------ parameter init --------------------------------
def _linear_params(key, din, dout, w_dtype):
    kw, _ = jax.random.split(key)
    wt = jax.random.normal(kw, (din, dout), jnp.float32) * (1.0 / jnp.sqrt(din))
    b = jnp.zeros((1, dout), jnp.float32)
    return (wt.astype(w_dtype), b)         # weights bf16-staged for the MXU; biases fp32


def _mlp_params(key, din, sizes, w_dtype=jnp.bfloat16):
    params, d = [], din
    for s in sizes:
        key, sub = jax.random.split(key)
        params.append(_linear_params(sub, d, s, w_dtype))
        d = s
    return params


def init_gnblock_params(key):
    sizes = [HIDDEN] * MLP_LAYERS + [LATENT]
    params = {"layers": []}
    for i in range(NUM_MP_STEPS):
        key, k_e, k_n, k_g = jax.random.split(key, 4)
        params["layers"].append({
            "edge":   _mlp_params(k_e, LATENT * (6 if USE_FACE else 4), sizes),
            "node":   _mlp_params(k_n, LATENT * (5 if USE_FACE else 4), sizes),
            "global": (_mlp_params(k_g, LATENT * (4 if USE_FACE else 3), sizes)
                       if i < NUM_MP_STEPS - 1 else None),
        })
    key, k_dec, k_pn, k_pe = jax.random.split(key, 4)
    params["pos_decoder"] = _mlp_params(k_dec, LATENT, [LATENT, 3])   # MLPwoLastAct
    # positional-embedding weights feed VPU / tiny-K paths -> keep fp32
    params["pos_embed_node"] = _mlp_params(k_pn, 3, [LATENT], w_dtype=jnp.float32)
    params["pos_embed_edge"] = _mlp_params(k_pe, 1, [LATENT], w_dtype=jnp.float32)
    return params


# ------------------------------ forward ----------------------------------------
def gnblock_forward(params, x, edge_index, edge_attr, u, node_batch, edge_batch,
                    num_nodes, num_edges, pos, rng):
    del num_nodes, num_edges  # implied by (sorted) node_batch / edge_batch here
    n = x.shape[0]
    e = edge_attr.shape[0]
    # x.new_zeros((N, 3)).uniform_(-1, 1)
    last_pos_pred = jax.random.uniform(rng, (n, 3), jnp.float32, -1.0, 1.0)
    # TODO(synk): pos_embedding.get_mask_idx source not provided; no positions masked.
    pos_mask_idx = jnp.zeros((n,), dtype=bool)
    mask_f = pos_mask_idx.astype(jnp.float32).reshape(n, 1)

    # lane-major (1, m) int32 index rows (no (m,1) lane-padding waste)
    src_row = edge_index[0].reshape(1, e).astype(jnp.int32)
    dst_row = edge_index[1].reshape(1, e).astype(jnp.int32)
    nb_row = node_batch.reshape(1, n).astype(jnp.int32)
    eb_row = edge_batch.reshape(1, e).astype(jnp.int32)

    x_out, edge_out, u_out, pos_predictions = gnblock_apply(
        params, x, edge_attr, u, pos, last_pos_pred, mask_f,
        src_row, dst_row, nb_row, eb_row)

    face = None  # use_face=False in this instantiation
    return x_out, edge_out, face, u_out, pos_predictions, pos_mask_idx


# ------------------------------ demo / entry point -----------------------------
if __name__ == "__main__":
    key = jax.random.PRNGKey(0)
    N, E, G = 8, 16, 2
    k_par, k_x, k_e, k_u, k_pos, k_last = jax.random.split(key, 6)

    params = init_gnblock_params(k_par)
    x = jax.random.normal(k_x, (N, LATENT), jnp.float32)
    edge_attr = jax.random.normal(k_e, (E, LATENT), jnp.float32)
    u = jax.random.normal(k_u, (G, LATENT), jnp.float32)
    pos = jax.random.normal(k_pos, (N, 3), jnp.float32)

    node_batch = jnp.array([0, 0, 0, 0, 1, 1, 1, 1], jnp.int32)
    src = jnp.array([0, 1, 2, 3, 0, 2, 1, 3, 4, 5, 6, 7, 4, 6, 5, 7], jnp.int32)
    dst = jnp.array([1, 2, 3, 0, 2, 0, 3, 1, 5, 6, 7, 4, 6, 4, 7, 5], jnp.int32)
    edge_index = jnp.stack([src, dst])
    edge_batch = jnp.array([0] * 8 + [1] * 8, jnp.int32)
    num_nodes = jnp.array([4, 4], jnp.int32)
    num_edges = jnp.array([8, 8], jnp.int32)

    out = gnblock_forward(params, x, edge_index, edge_attr, u, node_batch,
                          edge_batch, num_nodes, num_edges, pos, k_last)
    x_out, edge_out, face_out, u_out, pos_preds, mask_idx = out
    jax.block_until_ready((x_out, edge_out, u_out, pos_preds))

    assert x_out.shape == (N, LATENT)
    assert edge_out.shape == (E, LATENT)
    assert u_out.shape == (G, LATENT)
    assert len(pos_preds) == NUM_MP_STEPS and pos_preds[0].shape == (N, 3)
    assert bool(jnp.all(jnp.isfinite(x_out))) and bool(jnp.all(jnp.isfinite(pos_preds[-1])))
    print("KERNEL_OK")
</pallas_src>

<mosaic_0001>
module attributes {stable_mosaic.version = 11 : i64} {
  func.func @_gn_forward_kernel(%arg0: memref<1x16xi32, #tpu.memory_space<vmem>>, %arg1: memref<1x16xi32, #tpu.memory_space<vmem>>, %arg2: memref<1x8xi32, #tpu.memory_space<vmem>>, %arg3: memref<1x16xi32, #tpu.memory_space<vmem>>, %arg4: memref<8x32xf32, #tpu.memory_space<vmem>>, %arg5: memref<16x32xf32, #tpu.memory_space<vmem>>, %arg6: memref<2x32xf32, #tpu.memory_space<vmem>>, %arg7: memref<8x3xf32, #tpu.memory_space<vmem>>, %arg8: memref<8x3xf32, #tpu.memory_space<vmem>>, %arg9: memref<8x1xf32, #tpu.memory_space<vmem>>, %arg10: memref<3x32xf32, #tpu.memory_space<vmem>>, %arg11: memref<1x32xf32, #tpu.memory_space<vmem>>, %arg12: memref<1x32xf32, #tpu.memory_space<vmem>>, %arg13: memref<1x32xf32, #tpu.memory_space<vmem>>, %arg14: memref<32x32xbf16, #tpu.memory_space<vmem>>, %arg15: memref<1x32xf32, #tpu.memory_space<vmem>>, %arg16: memref<32x3xbf16, #tpu.memory_space<vmem>>, %arg17: memref<1x3xf32, #tpu.memory_space<vmem>>, %arg18: memref<128x32xbf16, #tpu.memory_space<vmem>>, %arg19: memref<1x32xf32, #tpu.memory_space<vmem>>, %arg20: memref<32x32xbf16, #tpu.memory_space<vmem>>, %arg21: memref<1x32xf32, #tpu.memory_space<vmem>>, %arg22: memref<32x32xbf16, #tpu.memory_space<vmem>>, %arg23: memref<1x32xf32, #tpu.memory_space<vmem>>, %arg24: memref<128x32xbf16, #tpu.memory_space<vmem>>, %arg25: memref<1x32xf32, #tpu.memory_space<vmem>>, %arg26: memref<32x32xbf16, #tpu.memory_space<vmem>>, %arg27: memref<1x32xf32, #tpu.memory_space<vmem>>, %arg28: memref<32x32xbf16, #tpu.memory_space<vmem>>, %arg29: memref<1x32xf32, #tpu.memory_space<vmem>>, %arg30: memref<96x32xbf16, #tpu.memory_space<vmem>>, %arg31: memref<1x32xf32, #tpu.memory_space<vmem>>, %arg32: memref<32x32xbf16, #tpu.memory_space<vmem>>, %arg33: memref<1x32xf32, #tpu.memory_space<vmem>>, %arg34: memref<32x32xbf16, #tpu.memory_space<vmem>>, %arg35: memref<1x32xf32, #tpu.memory_space<vmem>>, %arg36: memref<128x32xbf16, #tpu.memory_space<vmem>>, %arg37: memref<1x32xf32, #tpu.memory_space<vmem>>, %arg38: memref<32x32xbf16, #tpu.memory_space<vmem>>, %arg39: memref<1x32xf32, #tpu.memory_space<vmem>>, %arg40: memref<32x32xbf16, #tpu.memory_space<vmem>>, %arg41: memref<1x32xf32, #tpu.memory_space<vmem>>, %arg42: memref<128x32xbf16, #tpu.memory_space<vmem>>, %arg43: memref<1x32xf32, #tpu.memory_space<vmem>>, %arg44: memref<32x32xbf16, #tpu.memory_space<vmem>>, %arg45: memref<1x32xf32, #tpu.memory_space<vmem>>, %arg46: memref<32x32xbf16, #tpu.memory_space<vmem>>, %arg47: memref<1x32xf32, #tpu.memory_space<vmem>>, %arg48: memref<8x32xf32, #tpu.memory_space<vmem>>, %arg49: memref<16x32xf32, #tpu.memory_space<vmem>>, %arg50: memref<2x32xf32, #tpu.memory_space<vmem>>, %arg51: memref<8x3xf32, #tpu.memory_space<vmem>>, %arg52: memref<8x3xf32, #tpu.memory_space<vmem>>) attributes {dimension_semantics = [], scalar_prefetch = 0 : i64, scratch_operands = 0 : i64, tpu.core_type = #tpu.core_type<tc>} {
    %c0 = arith.constant 0 : index
    %c0_0 = arith.constant 0 : index
    %0 = vector.load %arg4[%c0, %c0_0] : memref<8x32xf32, #tpu.memory_space<vmem>>, vector<8x32xf32>
    %c0_1 = arith.constant 0 : index
    %c0_2 = arith.constant 0 : index
    %1 = vector.load %arg5[%c0_1, %c0_2] : memref<16x32xf32, #tpu.memory_space<vmem>>, vector<16x32xf32>
    %c0_3 = arith.constant 0 : index
    %c0_4 = arith.constant 0 : index
    %2 = vector.load %arg6[%c0_3, %c0_4] : memref<2x32xf32, #tpu.memory_space<vmem>>, vector<2x32xf32>
    %c0_5 = arith.constant 0 : index
    %c0_6 = arith.constant 0 : index
    %3 = vector.load %arg7[%c0_5, %c0_6] : memref<8x3xf32, #tpu.memory_space<vmem>>, vector<8x3xf32>
    %c0_7 = arith.constant 0 : index
    %c0_8 = arith.constant 0 : index
    %4 = vector.load %arg8[%c0_7, %c0_8] : memref<8x3xf32, #tpu.memory_space<vmem>>, vector<8x3xf32>
    %c0_9 = arith.constant 0 : index
    %c0_10 = arith.constant 0 : index
    %5 = vector.load %arg9[%c0_9, %c0_10] : memref<8x1xf32, #tpu.memory_space<vmem>>, vector<8x1xf32>
    %6 = tpu.iota {dimensions = array<i32: 0>} : vector<8x16xi32>
    %c0_11 = arith.constant 0 : index
    %c0_12 = arith.constant 0 : index
    %7 = vector.load %arg0[%c0_11, %c0_12] : memref<1x16xi32, #tpu.memory_space<vmem>>, vector<1x16xi32>
    %8 = vector.broadcast %7 : vector<1x16xi32> to vector<8x16xi32>
    %9 = arith.cmpi eq, %6, %8 : vector<8x16xi32>
    %10 = arith.extui %9 : vector<8x16xi1> to vector<8x16xi32>
    %11 = arith.sitofp %10 : vector<8x16xi32> to vector<8x16xf32>
    %12 = tpu.iota {dimensions = array<i32: 0>} : vector<8x16xi32>
    %c0_13 = arith.constant 0 : index
    %c0_14 = arith.constant 0 : index
    %13 = vector.load %arg1[%c0_13, %c0_14] : memref<1x16xi32, #tpu.memory_space<vmem>>, vector<1x16xi32>
    %14 = vector.broadcast %13 : vector<1x16xi32> to vector<8x16xi32>
    %15 = arith.cmpi eq, %12, %14 : vector<8x16xi32>
    %16 = arith.extui %15 : vector<8x16xi1> to vector<8x16xi32>
    %17 = arith.sitofp %16 : vector<8x16xi32> to vector<8x16xf32>
    %18 = tpu.iota {dimensions = array<i32: 0>} : vector<2x8xi32>
    %c0_15 = arith.constant 0 : index
    %c0_16 = arith.constant 0 : index
    %19 = vector.load %arg2[%c0_15, %c0_16] : memref<1x8xi32, #tpu.memory_space<vmem>>, vector<1x8xi32>
    %20 = vector.broadcast %19 : vector<1x8xi32> to vector<2x8xi32>
    %21 = arith.cmpi eq, %18, %20 : vector<2x8xi32>
    %22 = arith.extui %21 : vector<2x8xi1> to vector<2x8xi32>
    %23 = arith.sitofp %22 : vector<2x8xi32> to vector<2x8xf32>
    %24 = tpu.iota {dimensions = array<i32: 0>} : vector<2x16xi32>
    %c0_17 = arith.constant 0 : index
    %c0_18 = arith.constant 0 : index
    %25 = vector.load %arg3[%c0_17, %c0_18] : memref<1x16xi32, #tpu.memory_space<vmem>>, vector<1x16xi32>
    %26 = vector.broadcast %25 : vector<1x16xi32> to vector<2x16xi32>
    %27 = arith.cmpi eq, %24, %26 : vector<2x16xi32>
    %28 = arith.extui %27 : vector<2x16xi1> to vector<2x16xi32>
    %29 = arith.sitofp %28 : vector<2x16xi32> to vector<2x16xf32>
    %30 = tpu.transpose %11, [1, 0] : vector<8x16xf32> -> vector<16x8xf32>
    %31 = tpu.transpose %17, [1, 0] : vector<8x16xf32> -> vector<16x8xf32>
    %32 = tpu.transpose %23, [1, 0] : vector<2x8xf32> -> vector<8x2xf32>
    %33 = tpu.transpose %29, [1, 0] : vector<2x16xf32> -> vector<16x2xf32>
    %cst = arith.constant dense<0.000000e+00> : vector<2xf32>
    %34 = vector.multi_reduction <add>, %23, %cst [1] : vector<2x8xf32> to vector<2xf32>
    %35 = vector.shape_cast %34 : vector<2xf32> to vector<2x1xf32>
    %cst_19 = arith.constant 1.000000e+00 : f32
    %36 = vector.broadcast %cst_19 : f32 to vector<2x1xf32>
    %37 = arith.maximumf %35, %36 : vector<2x1xf32>
    %cst_20 = arith.constant 1.000000e+00 : f32
    %38 = vector.broadcast %cst_20 : f32 to vector<2x1xf32>
    %39 = arith.divf %38, %37 : vector<2x1xf32>
    %40 = vector.broadcast %5 : vector<8x1xf32> to vector<8x3xf32>
    %41 = arith.mulf %40, %4 : vector<8x3xf32>
    %cst_21 = arith.constant 1.000000e+00 : f32
    %42 = vector.broadcast %cst_21 : f32 to vector<8x1xf32>
    %43 = arith.subf %42, %5 : vector<8x1xf32>
    %44 = vector.broadcast %43 : vector<8x1xf32> to vector<8x3xf32>
    %45 = arith.mulf %44, %3 : vector<8x3xf32>
    %46 = arith.addf %41, %45 : vector<8x3xf32>
    %c0_22 = arith.constant 0 : index
    %c0_23 = arith.constant 0 : index
    %47 = vector.load %arg10[%c0_22, %c0_23] : memref<3x32xf32, #tpu.memory_space<vmem>>, vector<3x32xf32>
    %cst_24 = arith.constant dense<0.000000e+00> : vector<8x32xf32>
    %48 = tpu.matmul %46, %47, %cst_24 {dimension_numbers = #tpu.dot_dimension_numbers<[1], [0], [0], [1], [0, 0, 1, 1], [], []>} : vector<8x3xf32>, vector<3x32xf32>, vector<8x32xf32> -> vector<8x32xf32>
    %49 = arith.addf %0, %48 : vector<8x32xf32>
    %c0_25 = arith.constant 0 : index
    %c0_26 = arith.constant 0 : index
    %50 = vector.load %arg11[%c0_25, %c0_26] : memref<1x32xf32, #tpu.memory_space<vmem>>, vector<1x32xf32>
    %51 = vector.broadcast %50 : vector<1x32xf32> to vector<8x32xf32>
    %52 = arith.addf %49, %51 : vector<8x32xf32>
    %53 = arith.subf %30, %31 : vector<16x8xf32>
    %cst_27 = arith.constant dense<0.000000e+00> : vector<16x3xf32>
    %54 = tpu.matmul %53, %46, %cst_27 {dimension_numbers = #tpu.dot_dimension_numbers<[1], [0], [0], [1], [0, 0, 1, 1], [], []>} : vector<16x8xf32>, vector<8x3xf32>, vector<16x3xf32> -> vector<16x3xf32>
    %55 = arith.mulf %54, %54 : vector<16x3xf32>
    %cst_28 = arith.constant dense<0.000000e+00> : vector<16xf32>
    %56 = vector.multi_reduction <add>, %55, %cst_28 [1] : vector<16x3xf32> to vector<16xf32>
    %57 = vector.shape_cast %56 : vector<16xf32> to vector<16x1xf32>
    %c0_29 = arith.constant 0 : index
    %c0_30 = arith.constant 0 : index
    %58 = vector.load %arg12[%c0_29, %c0_30] : memref<1x32xf32, #tpu.memory_space<vmem>>, vector<1x32xf32>
    %59 = vector.broadcast %57 : vector<16x1xf32> to vector<16x32xf32>
    %60 = vector.broadcast %58 : vector<1x32xf32> to vector<16x32xf32>
    %61 = arith.mulf %59, %60 : vector<16x32xf32>
    %62 = arith.addf %1, %61 : vector<16x32xf32>
    %c0_31 = arith.constant 0 : index
    %c0_32 = arith.constant 0 : index
    %63 = vector.load %arg13[%c0_31, %c0_32] : memref<1x32xf32, #tpu.memory_space<vmem>>, vector<1x32xf32>
    %64 = vector.broadcast %63 : vector<1x32xf32> to vector<16x32xf32>
    %65 = arith.addf %62, %64 : vector<16x32xf32>
    %cst_33 = arith.constant dense<0.000000e+00> : vector<16x32xf32>
    %66 = tpu.matmul %30, %52, %cst_33 {dimension_numbers = #tpu.dot_dimension_numbers<[1], [0], [0], [1], [0, 0, 1, 1], [], []>} : vector<16x8xf32>, vector<8x32xf32>, vector<16x32xf32> -> vector<16x32xf32>
    %cst_34 = arith.constant dense<0.000000e+00> : vector<16x32xf32>
    %67 = tpu.matmul %31, %52, %cst_34 {dimension_numbers = #tpu.dot_dimension_numbers<[1], [0], [0], [1], [0, 0, 1, 1], [], []>} : vector<16x8xf32>, vector<8x32xf32>, vector<16x32xf32> -> vector<16x32xf32>
    %cst_35 = arith.constant dense<0.000000e+00> : vector<16x32xf32>
    %68 = tpu.matmul %33, %2, %cst_35 {dimension_numbers = #tpu.dot_dimension_numbers<[1], [0], [0], [1], [0, 0, 1, 1], [], []>} : vector<16x2xf32>, vector<2x32xf32>, vector<16x32xf32> -> vector<16x32xf32>
    %c0_36 = arith.constant 0 : index
    %c0_37 = arith.constant 0 : index
    %69 = vector.load %arg18[%c0_36, %c0_37] : memref<128x32xbf16, #tpu.memory_space<vmem>>, vector<128x32xbf16>
    %c0_38 = arith.constant 0 : index
    %c0_39 = arith.constant 0 : index
    %70 = vector.load %arg19[%c0_38, %c0_39] : memref<1x32xf32, #tpu.memory_space<vmem>>, vector<1x32xf32>
    %71 = arith.truncf %66 : vector<16x32xf32> to vector<16x32xbf16>
    %72 = vector.extract_strided_slice %69 {offsets = [0, 0], sizes = [32, 32], strides = [1, 1]} : vector<128x32xbf16> to vector<32x32xbf16>
    %cst_40 = arith.constant dense<0.000000e+00> : vector<16x32xf32>
    %73 = tpu.matmul %71, %72, %cst_40 {dimension_numbers = #tpu.dot_dimension_numbers<[1], [0], [0], [1], [0, 0, 1, 1], [], []>} : vector<16x32xbf16>, vector<32x32xbf16>, vector<16x32xf32> -> vector<16x32xf32>
    %74 = vector.broadcast %70 : vector<1x32xf32> to vector<16x32xf32>
    %75 = arith.addf %74, %73 : vector<16x32xf32>
    %76 = arith.truncf %67 : vector<16x32xf32> to vector<16x32xbf16>
    %77 = vector.extract_strided_slice %69 {offsets = [32, 0], sizes = [32, 32], strides = [1, 1]} : vector<128x32xbf16> to vector<32x32xbf16>
    %cst_41 = arith.constant dense<0.000000e+00> : vector<16x32xf32>
    %78 = tpu.matmul %76, %77, %cst_41 {dimension_numbers = #tpu.dot_dimension_numbers<[1], [0], [0], [1], [0, 0, 1, 1], [], []>} : vector<16x32xbf16>, vector<32x32xbf16>, vector<16x32xf32> -> vector<16x32xf32>
    %79 = arith.addf %75, %78 : vector<16x32xf32>
    %80 = arith.truncf %65 : vector<16x32xf32> to vector<16x32xbf16>
    %81 = vector.extract_strided_slice %69 {offsets = [64, 0], sizes = [32, 32], strides = [1, 1]} : vector<128x32xbf16> to vector<32x32xbf16>
    %cst_42 = arith.constant dense<0.000000e+00> : vector<16x32xf32>
    %82 = tpu.matmul %80, %81, %cst_42 {dimension_numbers = #tpu.dot_dimension_numbers<[1], [0], [0], [1], [0, 0, 1, 1], [], []>} : vector<16x32xbf16>, vector<32x32xbf16>, vector<16x32xf32> -> vector<16x32xf32>
    %83 = arith.addf %79, %82 : vector<16x32xf32>
    %84 = arith.truncf %68 : vector<16x32xf32> to vector<16x32xbf16>
    %85 = vector.extract_strided_slice %69 {offsets = [96, 0], sizes = [32, 32], strides = [1, 1]} : vector<128x32xbf16> to vector<32x32xbf16>
    %cst_43 = arith.constant dense<0.000000e+00> : vector<16x32xf32>
    %86 = tpu.matmul %84, %85, %cst_43 {dimension_numbers = #tpu.dot_dimension_numbers<[1], [0], [0], [1], [0, 0, 1, 1], [], []>} : vector<16x32xbf16>, vector<32x32xbf16>, vector<16x32xf32> -> vector<16x32xf32>
    %87 = arith.addf %83, %86 : vector<16x32xf32>
    %cst_44 = arith.constant 0.000000e+00 : f32
    %88 = vector.broadcast %cst_44 : f32 to vector<16x32xf32>
    %89 = arith.maximumf %87, %88 : vector<16x32xf32>
    %90 = arith.truncf %89 : vector<16x32xf32> to vector<16x32xbf16>
    %c0_45 = arith.constant 0 : index
    %c0_46 = arith.constant 0 : index
    %91 = vector.load %arg20[%c0_45, %c0_46] : memref<32x32xbf16, #tpu.memory_space<vmem>>, vector<32x32xbf16>
    %cst_47 = arith.constant dense<0.000000e+00> : vector<16x32xf32>
    %92 = tpu.matmul %90, %91, %cst_47 {dimension_numbers = #tpu.dot_dimension_numbers<[1], [0], [0], [1], [0, 0, 1, 1], [], []>} : vector<16x32xbf16>, vector<32x32xbf16>, vector<16x32xf32> -> vector<16x32xf32>
    %c0_48 = arith.constant 0 : index
    %c0_49 = arith.constant 0 : index
    %93 = vector.load %arg21[%c0_48, %c0_49] : memref<1x32xf32, #tpu.memory_space<vmem>>, vector<1x32xf32>
    %94 = vector.broadcast %93 : vector<1x32xf32> to vector<16x32xf32>
    %95 = arith.addf %92, %94 : vector<16x32xf32>
    %cst_50 = arith.constant 0.000000e+00 : f32
    %96 = vector.broadcast %cst_50 : f32 to vector<16x32xf32>
    %97 = arith.maximumf %95, %96 : vector<16x32xf32>
    %98 = arith.truncf %97 : vector<16x32xf32> to vector<16x32xbf16>
    %c0_51 = arith.constant 0 : index
    %c0_52 = arith.constant 0 : index
    %99 = vector.load %arg22[%c0_51, %c0_52] : memref<32x32xbf16, #tpu.memory_space<vmem>>, vector<32x32xbf16>
    %cst_53 = arith.constant dense<0.000000e+00> : vector<16x32xf32>
    %100 = tpu.matmul %98, %99, %cst_53 {dimension_numbers = #tpu.dot_dimension_numbers<[1], [0], [0], [1], [0, 0, 1, 1], [], []>} : vector<16x32xbf16>, vector<32x32xbf16>, vector<16x32xf32> -> vector<16x32xf32>
    %c0_54 = arith.constant 0 : index
    %c0_55 = arith.constant 0 : index
    %101 = vector.load %arg23[%c0_54, %c0_55] : memref<1x32xf32, #tpu.memory_space<vmem>>, vector<1x32xf32>
    %102 = vector.broadcast %101 : vector<1x32xf32> to vector<16x32xf32>
    %103 = arith.addf %100, %102 : vector<16x32xf32>
    %cst_56 = arith.constant dense<0.000000e+00> : vector<8x32xf32>
    %104 = tpu.matmul %11, %103, %cst_56 {dimension_numbers = #tpu.dot_dimension_numbers<[1], [0], [0], [1], [0, 0, 1, 1], [], []>} : vector<8x16xf32>, vector<16x32xf32>, vector<8x32xf32> -> vector<8x32xf32>
    %cst_57 = arith.constant dense<0.000000e+00> : vector<8x32xf32>
    %105 = tpu.matmul %17, %103, %cst_57 {dimension_numbers = #tpu.dot_dimension_numbers<[1], [0], [0], [1], [0, 0, 1, 1], [], []>} : vector<8x16xf32>, vector<16x32xf32>, vector<8x32xf32> -> vector<8x32xf32>
    %cst_58 = arith.constant dense<0.000000e+00> : vector<8x32xf32>
    %106 = tpu.matmul %32, %2, %cst_58 {dimension_numbers = #tpu.dot_dimension_numbers<[1], [0], [0], [1], [0, 0, 1, 1], [], []>} : vector<8x2xf32>, vector<2x32xf32>, vector<8x32xf32> -> vector<8x32xf32>
    %c0_59 = arith.constant 0 : index
    %c0_60 = arith.constant 0 : index
    %107 = vector.load %arg24[%c0_59, %c0_60] : memref<128x32xbf16, #tpu.memory_space<vmem>>, vector<128x32xbf16>
    %c0_61 = arith.constant 0 : index
    %c0_62 = arith.constant 0 : index
    %108 = vector.load %arg25[%c0_61, %c0_62] : memref<1x32xf32, #tpu.memory_space<vmem>>, vector<1x32xf32>
    %109 = arith.truncf %52 : vector<8x32xf32> to vector<8x32xbf16>
    %110 = vector.extract_strided_slice %107 {offsets = [0, 0], sizes = [32, 32], strides = [1, 1]} : vector<128x32xbf16> to vector<32x32xbf16>
    %cst_63 = arith.constant dense<0.000000e+00> : vector<8x32xf32>
    %111 = tpu.matmul %109, %110, %cst_63 {dimension_numbers = #tpu.dot_dimension_numbers<[1], [0], [0], [1], [0, 0, 1, 1], [], []>} : vector<8x32xbf16>, vector<32x32xbf16>, vector<8x32xf32> -> vector<8x32xf32>
    %112 = vector.broadcast %108 : vector<1x32xf32> to vector<8x32xf32>
    %113 = arith.addf %112, %111 : vector<8x32xf32>
    %114 = arith.truncf %104 : vector<8x32xf32> to vector<8x32xbf16>
    %115 = vector.extract_strided_slice %107 {offsets = [32, 0], sizes = [32, 32], strides = [1, 1]} : vector<128x32xbf16> to vector<32x32xbf16>
    %cst_64 = arith.constant dense<0.000000e+00> : vector<8x32xf32>
    %116 = tpu.matmul %114, %115, %cst_64 {dimension_numbers = #tpu.dot_dimension_numbers<[1], [0], [0], [1], [0, 0, 1, 1], [], []>} : vector<8x32xbf16>, vector<32x32xbf16>, vector<8x32xf32> -> vector<8x32xf32>
    %117 = arith.addf %113, %116 : vector<8x32xf32>
    %118 = arith.truncf %105 : vector<8x32xf32> to vector<8x32xbf16>
    %119 = vector.extract_strided_slice %107 {offsets = [64, 0], sizes = [32, 32], strides = [1, 1]} : vector<128x32xbf16> to vector<32x32xbf16>
    %cst_65 = arith.constant dense<0.000000e+00> : vector<8x32xf32>
    %120 = tpu.matmul %118, %119, %cst_65 {dimension_numbers = #tpu.dot_dimension_numbers<[1], [0], [0], [1], [0, 0, 1, 1], [], []>} : vector<8x32xbf16>, vector<32x32xbf16>, vector<8x32xf32> -> vector<8x32xf32>
    %121 = arith.addf %117, %120 : vector<8x32xf32>
    %122 = arith.truncf %106 : vector<8x32xf32> to vector<8x32xbf16>
    %123 = vector.extract_strided_slice %107 {offsets = [96, 0], sizes = [32, 32], strides = [1, 1]} : vector<128x32xbf16> to vector<32x32xbf16>
    %cst_66 = arith.constant dense<0.000000e+00> : vector<8x32xf32>
    %124 = tpu.matmul %122, %123, %cst_66 {dimension_numbers = #tpu.dot_dimension_numbers<[1], [0], [0], [1], [0, 0, 1, 1], [], []>} : vector<8x32xbf16>, vector<32x32xbf16>, vector<8x32xf32> -> vector<8x32xf32>
    %125 = arith.addf %121, %124 : vector<8x32xf32>
    %cst_67 = arith.constant 0.000000e+00 : f32
    %126 = vector.broadcast %cst_67 : f32 to vector<8x32xf32>
    %127 = arith.maximumf %125, %126 : vector<8x32xf32>
    %128 = arith.truncf %127 : vector<8x32xf32> to vector<8x32xbf16>
    %c0_68 = arith.constant 0 : index
    %c0_69 = arith.constant 0 : index
    %129 = vector.load %arg26[%c0_68, %c0_69] : memref<32x32xbf16, #tpu.memory_space<vmem>>, vector<32x32xbf16>
    %cst_70 = arith.constant dense<0.000000e+00> : vector<8x32xf32>
    %130 = tpu.matmul %128, %129, %cst_70 {dimension_numbers = #tpu.dot_dimension_numbers<[1], [0], [0], [1], [0, 0, 1, 1], [], []>} : vector<8x32xbf16>, vector<32x32xbf16>, vector<8x32xf32> -> vector<8x32xf32>
    %c0_71 = arith.constant 0 : index
    %c0_72 = arith.constant 0 : index
    %131 = vector.load %arg27[%c0_71, %c0_72] : memref<1x32xf32, #tpu.memory_space<vmem>>, vector<1x32xf32>
    %132 = vector.broadcast %131 : vector<1x32xf32> to vector<8x32xf32>
    %133 = arith.addf %130, %132 : vector<8x32xf32>
    %cst_73 = arith.constant 0.000000e+00 : f32
    %134 = vector.broadcast %cst_73 : f32 to vector<8x32xf32>
    %135 = arith.maximumf %133, %134 : vector<8x32xf32>
    %136 = arith.truncf %135 : vector<8x32xf32> to vector<8x32xbf16>
    %c0_74 = arith.constant 0 : index
    %c0_75 = arith.constant 0 : index
    %137 = vector.load %arg28[%c0_74, %c0_75] : memref<32x32xbf16, #tpu.memory_space<vmem>>, vector<32x32xbf16>
    %cst_76 = arith.constant dense<0.000000e+00> : vector<8x32xf32>
    %138 = tpu.matmul %136, %137, %cst_76 {dimension_numbers = #tpu.dot_dimension_numbers<[1], [0], [0], [1], [0, 0, 1, 1], [], []>} : vector<8x32xbf16>, vector<32x32xbf16>, vector<8x32xf32> -> vector<8x32xf32>
    %c0_77 = arith.constant 0 : index
    %c0_78 = arith.constant 0 : index
    %139 = vector.load %arg29[%c0_77, %c0_78] : memref<1x32xf32, #tpu.memory_space<vmem>>, vector<1x32xf32>
    %140 = vector.broadcast %139 : vector<1x32xf32> to vector<8x32xf32>
    %141 = arith.addf %138, %140 : vector<8x32xf32>
    %cst_79 = arith.constant dense<0.000000e+00> : vector<2x32xf32>
    %142 = tpu.matmul %23, %141, %cst_79 {dimension_numbers = #tpu.dot_dimension_numbers<[1], [0], [0], [1], [0, 0, 1, 1], [], []>} : vector<2x8xf32>, vector<8x32xf32>, vector<2x32xf32> -> vector<2x32xf32>
    %cst_80 = arith.constant dense<0.000000e+00> : vector<2x32xf32>
    %143 = tpu.matmul %29, %103, %cst_80 {dimension_numbers = #tpu.dot_dimension_numbers<[1], [0], [0], [1], [0, 0, 1, 1], [], []>} : vector<2x16xf32>, vector<16x32xf32>, vector<2x32xf32> -> vector<2x32xf32>
    %c0_81 = arith.constant 0 : index
    %c0_82 = arith.constant 0 : index
    %144 = vector.load %arg30[%c0_81, %c0_82] : memref<96x32xbf16, #tpu.memory_space<vmem>>, vector<96x32xbf16>
    %c0_83 = arith.constant 0 : index
    %c0_84 = arith.constant 0 : index
    %145 = vector.load %arg31[%c0_83, %c0_84] : memref<1x32xf32, #tpu.memory_space<vmem>>, vector<1x32xf32>
    %146 = arith.truncf %2 : vector<2x32xf32> to vector<2x32xbf16>
    %147 = vector.extract_strided_slice %144 {offsets = [0, 0], sizes = [32, 32], strides = [1, 1]} : vector<96x32xbf16> to vector<32x32xbf16>
    %cst_85 = arith.constant dense<0.000000e+00> : vector<2x32xf32>
    %148 = tpu.matmul %146, %147, %cst_85 {dimension_numbers = #tpu.dot_dimension_numbers<[1], [0], [0], [1], [0, 0, 1, 1], [], []>} : vector<2x32xbf16>, vector<32x32xbf16>, vector<2x32xf32> -> vector<2x32xf32>
    %149 = vector.broadcast %145 : vector<1x32xf32> to vector<2x32xf32>
    %150 = arith.addf %149, %148 : vector<2x32xf32>
    %151 = arith.truncf %142 : vector<2x32xf32> to vector<2x32xbf16>
    %152 = vector.extract_strided_slice %144 {offsets = [32, 0], sizes = [32, 32], strides = [1, 1]} : vector<96x32xbf16> to vector<32x32xbf16>
    %cst_86 = arith.constant dense<0.000000e+00> : vector<2x32xf32>
    %153 = tpu.matmul %151, %152, %cst_86 {dimension_numbers = #tpu.dot_dimension_numbers<[1], [0], [0], [1], [0, 0, 1, 1], [], []>} : vector<2x32xbf16>, vector<32x32xbf16>, vector<2x32xf32> -> vector<2x32xf32>
    %154 = arith.addf %150, %153 : vector<2x32xf32>
    %155 = arith.truncf %143 : vector<2x32xf32> to vector<2x32xbf16>
    %156 = vector.extract_strided_slice %144 {offsets = [64, 0], sizes = [32, 32], strides = [1, 1]} : vector<96x32xbf16> to vector<32x32xbf16>
    %cst_87 = arith.constant dense<0.000000e+00> : vector<2x32xf32>
    %157 = tpu.matmul %155, %156, %cst_87 {dimension_numbers = #tpu.dot_dimension_numbers<[1], [0], [0], [1], [0, 0, 1, 1], [], []>} : vector<2x32xbf16>, vector<32x32xbf16>, vector<2x32xf32> -> vector<2x32xf32>
    %158 = arith.addf %154, %157 : vector<2x32xf32>
    %cst_88 = arith.constant 0.000000e+00 : f32
    %159 = vector.broadcast %cst_88 : f32 to vector<2x32xf32>
    %160 = arith.maximumf %158, %159 : vector<2x32xf32>
    %161 = arith.truncf %160 : vector<2x32xf32> to vector<2x32xbf16>
    %c0_89 = arith.constant 0 : index
    %c0_90 = arith.constant 0 : index
    %162 = vector.load %arg32[%c0_89, %c0_90] : memref<32x32xbf16, #tpu.memory_space<vmem>>, vector<32x32xbf16>
    %cst_91 = arith.constant dense<0.000000e+00> : vector<2x32xf32>
    %163 = tpu.matmul %161, %162, %cst_91 {dimension_numbers = #tpu.dot_dimension_numbers<[1], [0], [0], [1], [0, 0, 1, 1], [], []>} : vector<2x32xbf16>, vector<32x32xbf16>, vector<2x32xf32> -> vector<2x32xf32>
    %c0_92 = arith.constant 0 : index
    %c0_93 = arith.constant 0 : index
    %164 = vector.load %arg33[%c0_92, %c0_93] : memref<1x32xf32, #tpu.memory_space<vmem>>, vector<1x32xf32>
    %165 = vector.broadcast %164 : vector<1x32xf32> to vector<2x32xf32>
    %166 = arith.addf %163, %165 : vector<2x32xf32>
    %cst_94 = arith.constant 0.000000e+00 : f32
    %167 = vector.broadcast %cst_94 : f32 to vector<2x32xf32>
    %168 = arith.maximumf %166, %167 : vector<2x32xf32>
    %169 = arith.truncf %168 : vector<2x32xf32> to vector<2x32xbf16>
    %c0_95 = arith.constant 0 : index
    %c0_96 = arith.constant 0 : index
    %170 = vector.load %arg34[%c0_95, %c0_96] : memref<32x32xbf16, #tpu.memory_space<vmem>>, vector<32x32xbf16>
    %cst_97 = arith.constant dense<0.000000e+00> : vector<2x32xf32>
    %171 = tpu.matmul %169, %170, %cst_97 {dimension_numbers = #tpu.dot_dimension_numbers<[1], [0], [0], [1], [0, 0, 1, 1], [], []>} : vector<2x32xbf16>, vector<32x32xbf16>, vector<2x32xf32> -> vector<2x32xf32>
    %c0_98 = arith.constant 0 : index
    %c0_99 = arith.constant 0 : index
    %172 = vector.load %arg35[%c0_98, %c0_99] : memref<1x32xf32, #tpu.memory_space<vmem>>, vector<1x32xf32>
    %173 = vector.broadcast %172 : vector<1x32xf32> to vector<2x32xf32>
    %174 = arith.addf %171, %173 : vector<2x32xf32>
    %175 = arith.addf %174, %2 : vector<2x32xf32>
    %176 = arith.addf %141, %0 : vector<8x32xf32>
    %177 = arith.addf %103, %1 : vector<16x32xf32>
    %c0_100 = arith.constant 0 : index
    %c0_101 = arith.constant 0 : index
    %178 = vector.load %arg14[%c0_100, %c0_101] : memref<32x32xbf16, #tpu.memory_space<vmem>>, vector<32x32xbf16>
    %c0_102 = arith.constant 0 : index
    %c0_103 = arith.constant 0 : index
    %179 = vector.load %arg15[%c0_102, %c0_103] : memref<1x32xf32, #tpu.memory_space<vmem>>, vector<1x32xf32>
    %180 = arith.truncf %176 : vector<8x32xf32> to vector<8x32xbf16>
    %cst_104 = arith.constant dense<0.000000e+00> : vector<8x32xf32>
    %181 = tpu.matmul %180, %178, %cst_104 {dimension_numbers = #tpu.dot_dimension_numbers<[1], [0], [0], [1], [0, 0, 1, 1], [], []>} : vector<8x32xbf16>, vector<32x32xbf16>, vector<8x32xf32> -> vector<8x32xf32>
    %182 = vector.broadcast %179 : vector<1x32xf32> to vector<8x32xf32>
    %183 = arith.addf %182, %181 : vector<8x32xf32>
    %cst_105 = arith.constant 0.000000e+00 : f32
    %184 = vector.broadcast %cst_105 : f32 to vector<8x32xf32>
    %185 = arith.maximumf %183, %184 : vector<8x32xf32>
    %186 = arith.truncf %185 : vector<8x32xf32> to vector<8x32xbf16>
    %c0_106 = arith.constant 0 : index
    %c0_107 = arith.constant 0 : index
    %187 = vector.load %arg16[%c0_106, %c0_107] : memref<32x3xbf16, #tpu.memory_space<vmem>>, vector<32x3xbf16>
    %cst_108 = arith.constant dense<0.000000e+00> : vector<8x3xf32>
    %188 = tpu.matmul %186, %187, %cst_108 {dimension_numbers = #tpu.dot_dimension_numbers<[1], [0], [0], [1], [0, 0, 1, 1], [], []>} : vector<8x32xbf16>, vector<32x3xbf16>, vector<8x3xf32> -> vector<8x3xf32>
    %c0_109 = arith.constant 0 : index
    %c0_110 = arith.constant 0 : index
    %189 = vector.load %arg17[%c0_109, %c0_110] : memref<1x3xf32, #tpu.memory_space<vmem>>, vector<1x3xf32>
    %190 = vector.broadcast %189 : vector<1x3xf32> to vector<8x3xf32>
    %191 = arith.addf %188, %190 : vector<8x3xf32>
    %cst_111 = arith.constant dense<0.000000e+00> : vector<2x3xf32>
    %192 = tpu.matmul %23, %191, %cst_111 {dimension_numbers = #tpu.dot_dimension_numbers<[1], [0], [0], [1], [0, 0, 1, 1], [], []>} : vector<2x8xf32>, vector<8x3xf32>, vector<2x3xf32> -> vector<2x3xf32>
    %193 = vector.broadcast %39 : vector<2x1xf32> to vector<2x3xf32>
    %194 = arith.mulf %192, %193 : vector<2x3xf32>
    %cst_112 = arith.constant dense<0.000000e+00> : vector<8x3xf32>
    %195 = tpu.matmul %32, %194, %cst_112 {dimension_numbers = #tpu.dot_dimension_numbers<[1], [0], [0], [1], [0, 0, 1, 1], [], []>} : vector<8x2xf32>, vector<2x3xf32>, vector<8x3xf32> -> vector<8x3xf32>
    %196 = arith.subf %191, %195 : vector<8x3xf32>
    %c0_113 = arith.constant 0 : index
    %c0_114 = arith.constant 0 : index
    %197 = vector.load %arg51[%c0_113, %c0_114] : memref<8x3xf32, #tpu.memory_space<vmem>>, vector<8x3xf32>
    tpu.vector_store %arg51[%c0_113, %c0_114], %196 {strides = array<i32>} : memref<8x3xf32, #tpu.memory_space<vmem>>, vector<8x3xf32>,
    %198 = vector.broadcast %5 : vector<8x1xf32> to vector<8x3xf32>
    %199 = arith.mulf %198, %196 : vector<8x3xf32>
    %cst_115 = arith.constant 1.000000e+00 : f32
    %200 = vector.broadcast %cst_115 : f32 to vector<8x1xf32>
    %201 = arith.subf %200, %5 : vector<8x1xf32>
    %202 = vector.broadcast %201 : vector<8x1xf32> to vector<8x3xf32>
    %203 = arith.mulf %202, %3 : vector<8x3xf32>
    %204 = arith.addf %199, %203 : vector<8x3xf32>
    %c0_116 = arith.constant 0 : index
    %c0_117 = arith.constant 0 : index
    %205 = vector.load %arg10[%c0_116, %c0_117] : memref<3x32xf32, #tpu.memory_space<vmem>>, vector<3x32xf32>
    %cst_118 = arith.constant dense<0.000000e+00> : vector<8x32xf32>
    %206 = tpu.matmul %204, %205, %cst_118 {dimension_numbers = #tpu.dot_dimension_numbers<[1], [0], [0], [1], [0, 0, 1, 1], [], []>} : vector<8x3xf32>, vector<3x32xf32>, vector<8x32xf32> -> vector<8x32xf32>
    %207 = arith.addf %176, %206 : vector<8x32xf32>
    %c0_119 = arith.constant 0 : index
    %c0_120 = arith.constant 0 : index
    %208 = vector.load %arg11[%c0_119, %c0_120] : memref<1x32xf32, #tpu.memory_space<vmem>>, vector<1x32xf32>
    %209 = vector.broadcast %208 : vector<1x32xf32> to vector<8x32xf32>
    %210 = arith.addf %207, %209 : vector<8x32xf32>
    %211 = arith.subf %30, %31 : vector<16x8xf32>
    %cst_121 = arith.constant dense<0.000000e+00> : vector<16x3xf32>
    %212 = tpu.matmul %211, %204, %cst_121 {dimension_numbers = #tpu.dot_dimension_numbers<[1], [0], [0], [1], [0, 0, 1, 1], [], []>} : vector<16x8xf32>, vector<8x3xf32>, vector<16x3xf32> -> vector<16x3xf32>
    %213 = arith.mulf %212, %212 : vector<16x3xf32>
    %cst_122 = arith.constant dense<0.000000e+00> : vector<16xf32>
    %214 = vector.multi_reduction <add>, %213, %cst_122 [1] : vector<16x3xf32> to vector<16xf32>
    %215 = vector.shape_cast %214 : vector<16xf32> to vector<16x1xf32>
    %c0_123 = arith.constant 0 : index
    %c0_124 = arith.constant 0 : index
    %216 = vector.load %arg12[%c0_123, %c0_124] : memref<1x32xf32, #tpu.memory_space<vmem>>, vector<1x32xf32>
    %217 = vector.broadcast %215 : vector<16x1xf32> to vector<16x32xf32>
    %218 = vector.broadcast %216 : vector<1x32xf32> to vector<16x32xf32>
    %219 = arith.mulf %217, %218 : vector<16x32xf32>
    %220 = arith.addf %177, %219 : vector<16x32xf32>
    %c0_125 = arith.constant 0 : index
    %c0_126 = arith.constant 0 : index
    %221 = vector.load %arg13[%c0_125, %c0_126] : memref<1x32xf32, #tpu.memory_space<vmem>>, vector<1x32xf32>
    %222 = vector.broadcast %221 : vector<1x32xf32> to vector<16x32xf32>
    %223 = arith.addf %220, %222 : vector<16x32xf32>
    %cst_127 = arith.constant dense<0.000000e+00> : vector<16x32xf32>
    %224 = tpu.matmul %30, %210, %cst_127 {dimension_numbers = #tpu.dot_dimension_numbers<[1], [0], [0], [1], [0, 0, 1, 1], [], []>} : vector<16x8xf32>, vector<8x32xf32>, vector<16x32xf32> -> vector<16x32xf32>
    %cst_128 = arith.constant dense<0.000000e+00> : vector<16x32xf32>
    %225 = tpu.matmul %31, %210, %cst_128 {dimension_numbers = #tpu.dot_dimension_numbers<[1], [0], [0], [1], [0, 0, 1, 1], [], []>} : vector<16x8xf32>, vector<8x32xf32>, vector<16x32xf32> -> vector<16x32xf32>
    %cst_129 = arith.constant dense<0.000000e+00> : vector<16x32xf32>
    %226 = tpu.matmul %33, %175, %cst_129 {dimension_numbers = #tpu.dot_dimension_numbers<[1], [0], [0], [1], [0, 0, 1, 1], [], []>} : vector<16x2xf32>, vector<2x32xf32>, vector<16x32xf32> -> vector<16x32xf32>
    %c0_130 = arith.constant 0 : index
    %c0_131 = arith.constant 0 : index
    %227 = vector.load %arg36[%c0_130, %c0_131] : memref<128x32xbf16, #tpu.memory_space<vmem>>, vector<128x32xbf16>
    %c0_132 = arith.constant 0 : index
    %c0_133 = arith.constant 0 : index
    %228 = vector.load %arg37[%c0_132, %c0_133] : memref<1x32xf32, #tpu.memory_space<vmem>>, vector<1x32xf32>
    %229 = arith.truncf %224 : vector<16x32xf32> to vector<16x32xbf16>
    %230 = vector.extract_strided_slice %227 {offsets = [0, 0], sizes = [32, 32], strides = [1, 1]} : vector<128x32xbf16> to vector<32x32xbf16>
    %cst_134 = arith.constant dense<0.000000e+00> : vector<16x32xf32>
    %231 = tpu.matmul %229, %230, %cst_134 {dimension_numbers = #tpu.dot_dimension_numbers<[1], [0], [0], [1], [0, 0, 1, 1], [], []>} : vector<16x32xbf16>, vector<32x32xbf16>, vector<16x32xf32> -> vector<16x32xf32>
    %232 = vector.broadcast %228 : vector<1x32xf32> to vector<16x32xf32>
    %233 = arith.addf %232, %231 : vector<16x32xf32>
    %234 = arith.truncf %225 : vector<16x32xf32> to vector<16x32xbf16>
    %235 = vector.extract_strided_slice %227 {offsets = [32, 0], sizes = [32, 32], strides = [1, 1]} : vector<128x32xbf16> to vector<32x32xbf16>
    %cst_135 = arith.constant dense<0.000000e+00> : vector<16x32xf32>
    %236 = tpu.matmul %234, %235, %cst_135 {dimension_numbers = #tpu.dot_dimension_numbers<[1], [0], [0], [1], [0, 0, 1, 1], [], []>} : vector<16x32xbf16>, vector<32x32xbf16>, vector<16x32xf32> -> vector<16x32xf32>
    %237 = arith.addf %233, %236 : vector<16x32xf32>
    %238 = arith.truncf %223 : vector<16x32xf32> to vector<16x32xbf16>
    %239 = vector.extract_strided_slice %227 {offsets = [64, 0], sizes = [32, 32], strides = [1, 1]} : vector<128x32xbf16> to vector<32x32xbf16>
    %cst_136 = arith.constant dense<0.000000e+00> : vector<16x32xf32>
    %240 = tpu.matmul %238, %239, %cst_136 {dimension_numbers = #tpu.dot_dimension_numbers<[1], [0], [0], [1], [0, 0, 1, 1], [], []>} : vector<16x32xbf16>, vector<32x32xbf16>, vector<16x32xf32> -> vector<16x32xf32>
    %241 = arith.addf %237, %240 : vector<16x32xf32>
    %242 = arith.truncf %226 : vector<16x32xf32> to vector<16x32xbf16>
    %243 = vector.extract_strided_slice %227 {offsets = [96, 0], sizes = [32, 32], strides = [1, 1]} : vector<128x32xbf16> to vector<32x32xbf16>
    %cst_137 = arith.constant dense<0.000000e+00> : vector<16x32xf32>
    %244 = tpu.matmul %242, %243, %cst_137 {dimension_numbers = #tpu.dot_dimension_numbers<[1], [0], [0], [1], [0, 0, 1, 1], [], []>} : vector<16x32xbf16>, vector<32x32xbf16>, vector<16x32xf32> -> vector<16x32xf32>
    %245 = arith.addf %241, %244 : vector<16x32xf32>
    %cst_138 = arith.constant 0.000000e+00 : f32
    %246 = vector.broadcast %cst_138 : f32 to vector<16x32xf32>
    %247 = arith.maximumf %245, %246 : vector<16x32xf32>
    %248 = arith.truncf %247 : vector<16x32xf32> to vector<16x32xbf16>
    %c0_139 = arith.constant 0 : index
    %c0_140 = arith.constant 0 : index
    %249 = vector.load %arg38[%c0_139, %c0_140] : memref<32x32xbf16, #tpu.memory_space<vmem>>, vector<32x32xbf16>
    %cst_141 = arith.constant dense<0.000000e+00> : vector<16x32xf32>
    %250 = tpu.matmul %248, %249, %cst_141 {dimension_numbers = #tpu.dot_dimension_numbers<[1], [0], [0], [1], [0, 0, 1, 1], [], []>} : vector<16x32xbf16>, vector<32x32xbf16>, vector<16x32xf32> -> vector<16x32xf32>
    %c0_142 = arith.constant 0 : index
    %c0_143 = arith.constant 0 : index
    %251 = vector.load %arg39[%c0_142, %c0_143] : memref<1x32xf32, #tpu.memory_space<vmem>>, vector<1x32xf32>
    %252 = vector.broadcast %251 : vector<1x32xf32> to vector<16x32xf32>
    %253 = arith.addf %250, %252 : vector<16x32xf32>
    %cst_144 = arith.constant 0.000000e+00 : f32
    %254 = vector.broadcast %cst_144 : f32 to vector<16x32xf32>
    %255 = arith.maximumf %253, %254 : vector<16x32xf32>
    %256 = arith.truncf %255 : vector<16x32xf32> to vector<16x32xbf16>
    %c0_145 = arith.constant 0 : index
    %c0_146 = arith.constant 0 : index
    %257 = vector.load %arg40[%c0_145, %c0_146] : memref<32x32xbf16, #tpu.memory_space<vmem>>, vector<32x32xbf16>
    %cst_147 = arith.constant dense<0.000000e+00> : vector<16x32xf32>
    %258 = tpu.matmul %256, %257, %cst_147 {dimension_numbers = #tpu.dot_dimension_numbers<[1], [0], [0], [1], [0, 0, 1, 1], [], []>} : vector<16x32xbf16>, vector<32x32xbf16>, vector<16x32xf32> -> vector<16x32xf32>
    %c0_148 = arith.constant 0 : index
    %c0_149 = arith.constant 0 : index
    %259 = vector.load %arg41[%c0_148, %c0_149] : memref<1x32xf32, #tpu.memory_space<vmem>>, vector<1x32xf32>
    %260 = vector.broadcast %259 : vector<1x32xf32> to vector<16x32xf32>
    %261 = arith.addf %258, %260 : vector<16x32xf32>
    %cst_150 = arith.constant dense<0.000000e+00> : vector<8x32xf32>
    %262 = tpu.matmul %11, %261, %cst_150 {dimension_numbers = #tpu.dot_dimension_numbers<[1], [0], [0], [1], [0, 0, 1, 1], [], []>} : vector<8x16xf32>, vector<16x32xf32>, vector<8x32xf32> -> vector<8x32xf32>
    %cst_151 = arith.constant dense<0.000000e+00> : vector<8x32xf32>
    %263 = tpu.matmul %17, %261, %cst_151 {dimension_numbers = #tpu.dot_dimension_numbers<[1], [0], [0], [1], [0, 0, 1, 1], [], []>} : vector<8x16xf32>, vector<16x32xf32>, vector<8x32xf32> -> vector<8x32xf32>
    %cst_152 = arith.constant dense<0.000000e+00> : vector<8x32xf32>
    %264 = tpu.matmul %32, %175, %cst_152 {dimension_numbers = #tpu.dot_dimension_numbers<[1], [0], [0], [1], [0, 0, 1, 1], [], []>} : vector<8x2xf32>, vector<2x32xf32>, vector<8x32xf32> -> vector<8x32xf32>
    %c0_153 = arith.constant 0 : index
    %c0_154 = arith.constant 0 : index
    %265 = vector.load %arg42[%c0_153, %c0_154] : memref<128x32xbf16, #tpu.memory_space<vmem>>, vector<128x32xbf16>
    %c0_155 = arith.constant 0 : index
    %c0_156 = arith.constant 0 : index
    %266 = vector.load %arg43[%c0_155, %c0_156] : memref<1x32xf32, #tpu.memory_space<vmem>>, vector<1x32xf32>
    %267 = arith.truncf %210 : vector<8x32xf32> to vector<8x32xbf16>
    %268 = vector.extract_strided_slice %265 {offsets = [0, 0], sizes = [32, 32], strides = [1, 1]} : vector<128x32xbf16> to vector<32x32xbf16>
    %cst_157 = arith.constant dense<0.000000e+00> : vector<8x32xf32>
    %269 = tpu.matmul %267, %268, %cst_157 {dimension_numbers = #tpu.dot_dimension_numbers<[1], [0], [0], [1], [0, 0, 1, 1], [], []>} : vector<8x32xbf16>, vector<32x32xbf16>, vector<8x32xf32> -> vector<8x32xf32>
    %270 = vector.broadcast %266 : vector<1x32xf32> to vector<8x32xf32>
    %271 = arith.addf %270, %269 : vector<8x32xf32>
    %272 = arith.truncf %262 : vector<8x32xf32> to vector<8x32xbf16>
    %273 = vector.extract_strided_slice %265 {offsets = [32, 0], sizes = [32, 32], strides = [1, 1]} : vector<128x32xbf16> to vector<32x32xbf16>
    %cst_158 = arith.constant dense<0.000000e+00> : vector<8x32xf32>
    %274 = tpu.matmul %272, %273, %cst_158 {dimension_numbers = #tpu.dot_dimension_numbers<[1], [0], [0], [1], [0, 0, 1, 1], [], []>} : vector<8x32xbf16>, vector<32x32xbf16>, vector<8x32xf32> -> vector<8x32xf32>
    %275 = arith.addf %271, %274 : vector<8x32xf32>
    %276 = arith.truncf %263 : vector<8x32xf32> to vector<8x32xbf16>
    %277 = vector.extract_strided_slice %265 {offsets = [64, 0], sizes = [32, 32], strides = [1, 1]} : vector<128x32xbf16> to vector<32x32xbf16>
    %cst_159 = arith.constant dense<0.000000e+00> : vector<8x32xf32>
    %278 = tpu.matmul %276, %277, %cst_159 {dimension_numbers = #tpu.dot_dimension_numbers<[1], [0], [0], [1], [0, 0, 1, 1], [], []>} : vector<8x32xbf16>, vector<32x32xbf16>, vector<8x32xf32> -> vector<8x32xf32>
    %279 = arith.addf %275, %278 : vector<8x32xf32>
    %280 = arith.truncf %264 : vector<8x32xf32> to vector<8x32xbf16>
    %281 = vector.extract_strided_slice %265 {offsets = [96, 0], sizes = [32, 32], strides = [1, 1]} : vector<128x32xbf16> to vector<32x32xbf16>
    %cst_160 = arith.constant dense<0.000000e+00> : vector<8x32xf32>
    %282 = tpu.matmul %280, %281, %cst_160 {dimension_numbers = #tpu.dot_dimension_numbers<[1], [0], [0], [1], [0, 0, 1, 1], [], []>} : vector<8x32xbf16>, vector<32x32xbf16>, vector<8x32xf32> -> vector<8x32xf32>
    %283 = arith.addf %279, %282 : vector<8x32xf32>
    %cst_161 = arith.constant 0.000000e+00 : f32
    %284 = vector.broadcast %cst_161 : f32 to vector<8x32xf32>
    %285 = arith.maximumf %283, %284 : vector<8x32xf32>
    %286 = arith.truncf %285 : vector<8x32xf32> to vector<8x32xbf16>
    %c0_162 = arith.constant 0 : index
    %c0_163 = arith.constant 0 : index
    %287 = vector.load %arg44[%c0_162, %c0_163] : memref<32x32xbf16, #tpu.memory_space<vmem>>, vector<32x32xbf16>
    %cst_164 = arith.constant dense<0.000000e+00> : vector<8x32xf32>
    %288 = tpu.matmul %286, %287, %cst_164 {dimension_numbers = #tpu.dot_dimension_numbers<[1], [0], [0], [1], [0, 0, 1, 1], [], []>} : vector<8x32xbf16>, vector<32x32xbf16>, vector<8x32xf32> -> vector<8x32xf32>
    %c0_165 = arith.constant 0 : index
    %c0_166 = arith.constant 0 : index
    %289 = vector.load %arg45[%c0_165, %c0_166] : memref<1x32xf32, #tpu.memory_space<vmem>>, vector<1x32xf32>
    %290 = vector.broadcast %289 : vector<1x32xf32> to vector<8x32xf32>
    %291 = arith.addf %288, %290 : vector<8x32xf32>
    %cst_167 = arith.constant 0.000000e+00 : f32
    %292 = vector.broadcast %cst_167 : f32 to vector<8x32xf32>
    %293 = arith.maximumf %291, %292 : vector<8x32xf32>
    %294 = arith.truncf %293 : vector<8x32xf32> to vector<8x32xbf16>
    %c0_168 = arith.constant 0 : index
    %c0_169 = arith.constant 0 : index
    %295 = vector.load %arg46[%c0_168, %c0_169] : memref<32x32xbf16, #tpu.memory_space<vmem>>, vector<32x32xbf16>
    %cst_170 = arith.constant dense<0.000000e+00> : vector<8x32xf32>
    %296 = tpu.matmul %294, %295, %cst_170 {dimension_numbers = #tpu.dot_dimension_numbers<[1], [0], [0], [1], [0, 0, 1, 1], [], []>} : vector<8x32xbf16>, vector<32x32xbf16>, vector<8x32xf32> -> vector<8x32xf32>
    %c0_171 = arith.constant 0 : index
    %c0_172 = arith.constant 0 : index
    %297 = vector.load %arg47[%c0_171, %c0_172] : memref<1x32xf32, #tpu.memory_space<vmem>>, vector<1x32xf32>
    %298 = vector.broadcast %297 : vector<1x32xf32> to vector<8x32xf32>
    %299 = arith.addf %296, %298 : vector<8x32xf32>
    %300 = arith.addf %175, %175 : vector<2x32xf32>
    %301 = arith.addf %299, %176 : vector<8x32xf32>
    %302 = arith.addf %261, %177 : vector<16x32xf32>
    %c0_173 = arith.constant 0 : index
    %c0_174 = arith.constant 0 : index
    %303 = vector.load %arg14[%c0_173, %c0_174] : memref<32x32xbf16, #tpu.memory_space<vmem>>, vector<32x32xbf16>
    %c0_175 = arith.constant 0 : index
    %c0_176 = arith.constant 0 : index
    %304 = vector.load %arg15[%c0_175, %c0_176] : memref<1x32xf32, #tpu.memory_space<vmem>>, vector<1x32xf32>
    %305 = arith.truncf %301 : vector<8x32xf32> to vector<8x32xbf16>
    %cst_177 = arith.constant dense<0.000000e+00> : vector<8x32xf32>
    %306 = tpu.matmul %305, %303, %cst_177 {dimension_numbers = #tpu.dot_dimension_numbers<[1], [0], [0], [1], [0, 0, 1, 1], [], []>} : vector<8x32xbf16>, vector<32x32xbf16>, vector<8x32xf32> -> vector<8x32xf32>
    %307 = vector.broadcast %304 : vector<1x32xf32> to vector<8x32xf32>
    %308 = arith.addf %307, %306 : vector<8x32xf32>
    %cst_178 = arith.constant 0.000000e+00 : f32
    %309 = vector.broadcast %cst_178 : f32 to vector<8x32xf32>
    %310 = arith.maximumf %308, %309 : vector<8x32xf32>
    %311 = arith.truncf %310 : vector<8x32xf32> to vector<8x32xbf16>
    %c0_179 = arith.constant 0 : index
    %c0_180 = arith.constant 0 : index
    %312 = vector.load %arg16[%c0_179, %c0_180] : memref<32x3xbf16, #tpu.memory_space<vmem>>, vector<32x3xbf16>
    %cst_181 = arith.constant dense<0.000000e+00> : vector<8x3xf32>
    %313 = tpu.matmul %311, %312, %cst_181 {dimension_numbers = #tpu.dot_dimension_numbers<[1], [0], [0], [1], [0, 0, 1, 1], [], []>} : vector<8x32xbf16>, vector<32x3xbf16>, vector<8x3xf32> -> vector<8x3xf32>
    %c0_182 = arith.constant 0 : index
    %c0_183 = arith.constant 0 : index
    %314 = vector.load %arg17[%c0_182, %c0_183] : memref<1x3xf32, #tpu.memory_space<vmem>>, vector<1x3xf32>
    %315 = vector.broadcast %314 : vector<1x3xf32> to vector<8x3xf32>
    %316 = arith.addf %313, %315 : vector<8x3xf32>
    %cst_184 = arith.constant dense<0.000000e+00> : vector<2x3xf32>
    %317 = tpu.matmul %23, %316, %cst_184 {dimension_numbers = #tpu.dot_dimension_numbers<[1], [0], [0], [1], [0, 0, 1, 1], [], []>} : vector<2x8xf32>, vector<8x3xf32>, vector<2x3xf32> -> vector<2x3xf32>
    %318 = vector.broadcast %39 : vector<2x1xf32> to vector<2x3xf32>
    %319 = arith.mulf %317, %318 : vector<2x3xf32>
    %cst_185 = arith.constant dense<0.000000e+00> : vector<8x3xf32>
    %320 = tpu.matmul %32, %319, %cst_185 {dimension_numbers = #tpu.dot_dimension_numbers<[1], [0], [0], [1], [0, 0, 1, 1], [], []>} : vector<8x2xf32>, vector<2x3xf32>, vector<8x3xf32> -> vector<8x3xf32>
    %321 = arith.subf %316, %320 : vector<8x3xf32>
    %c0_186 = arith.constant 0 : index
    %c0_187 = arith.constant 0 : index
    %322 = vector.load %arg52[%c0_186, %c0_187] : memref<8x3xf32, #tpu.memory_space<vmem>>, vector<8x3xf32>
    tpu.vector_store %arg52[%c0_186, %c0_187], %321 {strides = array<i32>} : memref<8x3xf32, #tpu.memory_space<vmem>>, vector<8x3xf32>,
    %c0_188 = arith.constant 0 : index
    %c0_189 = arith.constant 0 : index
    %323 = vector.load %arg48[%c0_188, %c0_189] : memref<8x32xf32, #tpu.memory_space<vmem>>, vector<8x32xf32>
    tpu.vector_store %arg48[%c0_188, %c0_189], %301 {strides = array<i32>} : memref<8x32xf32, #tpu.memory_space<vmem>>, vector<8x32xf32>,
    %c0_190 = arith.constant 0 : index
    %c0_191 = arith.constant 0 : index
    %324 = vector.load %arg49[%c0_190, %c0_191] : memref<16x32xf32, #tpu.memory_space<vmem>>, vector<16x32xf32>
    tpu.vector_store %arg49[%c0_190, %c0_191], %302 {strides = array<i32>} : memref<16x32xf32, #tpu.memory_space<vmem>>, vector<16x32xf32>,
    %c0_192 = arith.constant 0 : index
    %c0_193 = arith.constant 0 : index
    %325 = vector.load %arg50[%c0_192, %c0_193] : memref<2x32xf32, #tpu.memory_space<vmem>>, vector<2x32xf32>
    tpu.vector_store %arg50[%c0_192, %c0_193], %300 {strides = array<i32>} : memref<2x32xf32, #tpu.memory_space<vmem>>, vector<2x32xf32>,
    return
  }
}

</mosaic_0001>

<bundles_post_ra>
// kernel: tpu_custom_call.1
= control target key start
LH: loop header
LB: loop body
LE: loop exit
PB: predicated region body
PF: predicated region fallthrough
CT: control target
= control target key end

     0   :  { %s5570_s6 = smov 1   ;;  %s5571_s10 = smov 2   ;;  %s6473_s0 = inlined_call_operand.smem [shape: u32[53], index: -1, kind: input, shape index: {}] }
   0x1   :  { %s5643_s5 = sld [smem:[%s6473_s0]]   ;;  %s5572_s14 = smov 3  }
   0x2   :  { %s5648_s9 = sld [smem:[%s6473_s0 + %s5570_s6]]   ;;  %s5573_s18 = smov 4  }
   0x3   :  { %s5653_s13 = sld [smem:[%s6473_s0 + %s5571_s10]]   ;;  %s5574_s22 = smov 5  }
   0x4   :  { %s5658_s17 = sld [smem:[%s6473_s0 + %s5572_s14]]   ;;  %s5575_s26 = smov 6  }
   0x5   :  { %s5663_s21 = sld [smem:[%s6473_s0 + %s5573_s18]]   ;;  %s5576_s30 = smov 7  }
   0x6   :  { %s5668_s25 = sld [smem:[%s6473_s0 + %s5574_s22]]   ;;  %s5577_s4 = smov 8  }
   0x7   :  { %s5673_s29 = sld [smem:[%s6473_s0 + %s5575_s26]]   ;;  %s5578_s10 = smov 9  }
   0x8   :  { %s5678_s3 = sld [smem:[%s6473_s0 + %s5576_s30]]   ;;  %s5579_s15 = smov 10  }
   0x9   :  { %6493 = sst [smem:[#allocation19_spill]] %s5653_s13  ;;  %s5580_s20 = smov 11  }
   0xa   :  { %s5683_s8 = sld [smem:[%s6473_s0 + %s5577_s4]]   ;;  %s5581_s26 = smov 12  }
   0xb   :  { %s5688_s14 = sld [smem:[%s6473_s0 + %s5578_s10]]   ;;  %s5582_s1 = smov 13  }
   0xc   :  { %6494 = sst [smem:[#allocation20_spill]] %s5668_s25  ;;  %s5583_s7 = smov 14  }
   0xd   :  { %s5693_s19 = sld [smem:[%s6473_s0 + %s5579_s15]]   ;;  %s5584_s15 = smov 15  }
   0xe   :  { %s5698_s24 = sld [smem:[%s6473_s0 + %s5580_s20]]   ;;  %s5585_s22 = smov 16  }
   0xf   :  { %s5703_s30 = sld [smem:[%s6473_s0 + %s5581_s26]]   ;;  %s5586_s28 = smov 17  }
  0x10   :  { %s5708_s6 = sld [smem:[%s6473_s0 + %s5582_s1]]  }
  0x11   :  { %s5713_s12 = sld [smem:[%s6473_s0 + %s5583_s7]]   ;;  %s5587_s7 = smov 18  }
  0x12   :  { %s5718_s20 = sld [smem:[%s6473_s0 + %s5584_s15]]   ;;  %s5588_s15 = smov 19  }
  0x13   :  { %s5723_s27 = sld [smem:[%s6473_s0 + %s5585_s22]]   ;;  %s5589_s22 = smov 20  }
  0x14   :  { %s5728_s4 = sld [smem:[%s6473_s0 + %s5586_s28]]   ;;  %s5590_s28 = smov 21  }
  0x15   :  { %6495 = sst [smem:[#allocation21_spill]] %s5703_s30 }
  0x16   :  { %6496 = sst [smem:[#allocation22_spill]] %s5708_s6 }
  0x17   :  { %6497 = sst [smem:[#allocation23_spill]] %s5713_s12 }
  0x18   :  { %6498 = sst [smem:[#allocation24_spill]] %s5718_s20 }
  0x19   :  { %6499 = sst [smem:[#allocation25_spill]] %s5723_s27 }
  0x1a   :  { %6500 = sst [smem:[#allocation26_spill]] %s5728_s4 }
  0x1b   :  { %s5733_s12 = sld [smem:[%s6473_s0 + %s5587_s7]]   ;;  %s5591_s7 = smov 22  }
  0x1c   :  { %s5738_s20 = sld [smem:[%s6473_s0 + %s5588_s15]]   ;;  %s5592_s15 = smov 23  }
  0x1d   :  { %s5743_s27 = sld [smem:[%s6473_s0 + %s5589_s22]]   ;;  %s5593_s22 = smov 24  }
  0x1e   :  { %s5748_s4 = sld [smem:[%s6473_s0 + %s5590_s28]]   ;;  %s5594_s28 = smov 25  }
  0x1f   :  { %s5753_s13 = sld [smem:[%s6473_s0 + %s5591_s7]]   ;;  %s5595_s7 = smov 26  }
  0x21   :  { %6501 = sst [smem:[#allocation27_spill]] %s5733_s12 }
  0x22   :  { %6502 = sst [smem:[#allocation28_spill]] %s5738_s20 }
  0x23   :  { %6503 = sst [smem:[#allocation29_spill]] %s5743_s27 }
  0x24   :  { %6504 = sst [smem:[#allocation30_spill]] %s5748_s4 }
  0x25   :  { %6505 = sst [smem:[#allocation31_spill]] %s5753_s13 }
  0x26   :  { %s5758_s20 = sld [smem:[%s6473_s0 + %s5592_s15]]   ;;  %s5596_s15 = smov 27  }
  0x27   :  { %s5763_s27 = sld [smem:[%s6473_s0 + %s5593_s22]]   ;;  %s5597_s22 = smov 28  }
  0x28   :  { %s5768_s4 = sld [smem:[%s6473_s0 + %s5594_s28]]   ;;  %s5598_s28 = smov 29  }
  0x29   :  { %s5773_s13 = sld [smem:[%s6473_s0 + %s5595_s7]]   ;;  %s5599_s7 = smov 30  }
  0x2c   :  { %6506 = sst [smem:[#allocation32_spill]] %s5758_s20 }
  0x2d   :  { %6507 = sst [smem:[#allocation33_spill]] %s5763_s27 }
  0x2e   :  { %6508 = sst [smem:[#allocation34_spill]] %s5768_s4 }
  0x2f   :  { %6509 = sst [smem:[#allocation35_spill]] %s5773_s13 }
  0x30   :  { %s5778_s20 = sld [smem:[%s6473_s0 + %s5596_s15]]   ;;  %s5600_s15 = smov 31  }
  0x31   :  { %s5783_s27 = sld [smem:[%s6473_s0 + %s5597_s22]]   ;;  %s5601_s22 = smov 32  }
  0x32   :  { %s5788_s4 = sld [smem:[%s6473_s0 + %s5598_s28]]   ;;  %s5602_s28 = smov 33  }
  0x33   :  { %s5793_s13 = sld [smem:[%s6473_s0 + %s5599_s7]]   ;;  %s5603_s7 = smov 34  }
  0x36   :  { %6510 = sst [smem:[#allocation36_spill]] %s5778_s20 }
  0x37   :  { %6511 = sst [smem:[#allocation37_spill]] %s5783_s27 }
  0x38   :  { %6512 = sst [smem:[#allocation38_spill]] %s5788_s4 }
  0x39   :  { %6513 = sst [smem:[#allocation39_spill]] %s5793_s13 }
  0x3a   :  { %s5798_s20 = sld [smem:[%s6473_s0 + %s5600_s15]]   ;;  %s5604_s15 = smov 35  }
  0x3b   :  { %s5803_s27 = sld [smem:[%s6473_s0 + %s5601_s22]]   ;;  %s5605_s22 = smov 36  }
  0x3c   :  { %s5808_s4 = sld [smem:[%s6473_s0 + %s5602_s28]]   ;;  %s5606_s28 = smov 37  }
  0x3d   :  { %s5813_s13 = sld [smem:[%s6473_s0 + %s5603_s7]]   ;;  %s5607_s7 = smov 38  }
  0x40   :  { %6514 = sst [smem:[#allocation40_spill]] %s5798_s20 }
  0x41   :  { %6515 = sst [smem:[#allocation41_spill]] %s5803_s27 }
  0x42   :  { %6516 = sst [smem:[#allocation42_spill]] %s5808_s4 }
  0x43   :  { %6517 = sst [smem:[#allocation43_spill]] %s5813_s13 }
  0x44   :  { %s5818_s20 = sld [smem:[%s6473_s0 + %s5604_s15]]   ;;  %s5608_s15 = smov 39  }
  0x45   :  { %s5823_s27 = sld [smem:[%s6473_s0 + %s5605_s22]]   ;;  %s5609_s22 = smov 40  }
  0x46   :  { %s5828_s4 = sld [smem:[%s6473_s0 + %s5606_s28]]   ;;  %s5610_s28 = smov 41  }
  0x47   :  { %s5833_s13 = sld [smem:[%s6473_s0 + %s5607_s7]]   ;;  %s5611_s7 = smov 42  }
  0x4a   :  { %6518 = sst [smem:[#allocation44_spill]] %s5818_s20 }
  0x4b   :  { %6519 = sst [smem:[#allocation45_spill]] %s5823_s27 }
  0x4c   :  { %6520 = sst [smem:[#allocation46_spill]] %s5828_s4 }
  0x4d   :  { %6521 = sst [smem:[#allocation47_spill]] %s5833_s13 }
  0x4e   :  { %s5838_s20 = sld [smem:[%s6473_s0 + %s5608_s15]]   ;;  %s5612_s15 = smov 43  }
  0x4f   :  { %s5843_s27 = sld [smem:[%s6473_s0 + %s5609_s22]]   ;;  %s5613_s22 = smov 44  }
  0x50   :  { %s5848_s4 = sld [smem:[%s6473_s0 + %s5610_s28]]   ;;  %s5614_s28 = smov 45  }
  0x51   :  { %s5853_s13 = sld [smem:[%s6473_s0 + %s5611_s7]]   ;;  %s5615_s7 = smov 46  }
  0x52   :  { %s5868_s6 = sld [smem:[%s6473_s0 + %s5614_s28]]   ;;  %s5618_s28 = smov 49  }
  0x53   :  { %s5888_s30 = sld [smem:[%s6473_s0 + %s5618_s28]]  }
  0x54   :  { %6522 = sst [smem:[#allocation48_spill]] %s5838_s20 }
  0x55   :  { %6523 = sst [smem:[#allocation49_spill]] %s5843_s27 }
  0x56   :  { %s5858_s20 = sld [smem:[%s6473_s0 + %s5612_s15]]   ;;  %s5616_s15 = smov 47  }
  0x57   :  { %6524 = sst [smem:[#allocation50_spill]] %s5853_s13 }
  0x58   :  { %s5863_s27 = sld [smem:[%s6473_s0 + %s5613_s22]]   ;;  %s5617_s22 = smov 48  }
  0x59   :  { %s5873_s13 = sld [smem:[%s6473_s0 + %s5615_s7]]   ;;  %s5619_s7 = smov 50  }
  0x5a   :  { %s5878_s25 = sld [smem:[%s6473_s0 + %s5616_s15]]   ;;  %s5620_s15 = smov 51  }
  0x5b   :  { %s5898_s12 = sld [smem:[%s6473_s0 + %s5620_s15]]  }
  0x5e   :  { %6525 = sst [smem:[#allocation51_spill]] %s5863_s27 }
  0x5f   :  { %6526 = sst [smem:[#allocation52_spill]] %s5873_s13 }
  0x60   :  { %s5883_s27 = sld [smem:[%s6473_s0 + %s5617_s22]]   ;;  %s5621_s22 = smov 52  }
  0x61   :  { %s5893_s13 = sld [smem:[%s6473_s0 + %s5619_s7]]  }
  0x66   :  { %6527 = sst [smem:[#allocation53_spill]] %s5883_s27 }
  0x67   :  { %s5903_s27 = sld [smem:[%s6473_s0 + %s5621_s22]]  }
  0x68   :  { %111 = vsyncpa [#allocation3], 0 }
  0x69   :  { %112 = vsyncpa [#allocation6], 0 }
  0x6a   :  { %113 = vsyncpa [#allocation9], 0 }
  0x6b   :  { %114 = vsyncpa [#allocation4], 0 }
  0x6c   :  { %115 = vsyncpa [#allocation12], 0  ;;  %s5622_s28 = smov [#allocation5]   ;;  %s5623_s2 = smov [#allocation2]  }
  0x6d   :  { %s216_s1 = sshll.u32 %s5622_s28, 4  ;;  %s204_s7 = sshll.u32 %s5623_s2, 4  ;;  %s217_s1 = int_to_ptr.vmem [resolvable:$true] %s216_s1  ;;  %s205_s7 = int_to_ptr.vmem [resolvable:$true] %s204_s7 }
  0x6e   :  { %s5406_s10 = scalar_lea.hbm %s5858_s20, 16 }
  0x6f   :  { %p5407_p0 = scmp.ne.s32.totalorder %s5858_s20, %s5406_s10  ;;  %p5410_p1 = scmp.lt.u32.totalorder %s5406_s10, %s5858_s20 }
  0x71   :  { %p5412_p2 = pnand %p5410_p1, %p5407_p0 }
  0x73   :  { %5415 = shalt.err (!%p5412_p2)
}
  0x74   :  { %s5416_s0 = scalar_lea.vmem %s217_s1, 16  ;;  %s5420_s11 = scalar_lea.vmem %s217_s1, 32 }
  0x75   :  { %p5417_p3 = scmp.ne.s32.totalorder %s217_s1, %s5416_s0  ;;  %p5421_p4 = scmp.lt.s32.totalorder %s217_s1, %s217_s1 }
  0x76   :  { %p5422_p5 = scmp.lt.s32.totalorder %s5420_s11, %s5416_s0 }
  0x78   :  { %p5423_p6 = por %p5422_p5, %p5421_p4 }
  0x7a   :  { %p5424_p7 = pnand %p5423_p6, %p5417_p3 }
  0x7c   :  { %5427 = shalt.err (!%p5424_p7)
}
  0x7d   :  { %219 = dma.hbm_to_vmem [thread:$0]  %s5858_s20, 16, %s217_s1, [#allocation6]  }
  0x7e   :  { %s5428_s15 = scalar_lea.hbm %s5848_s4, 16 }
  0x7f   :  { %p5429_p8 = scmp.ne.s32.totalorder %s5848_s4, %s5428_s15  ;;  %p5432_p9 = scmp.lt.u32.totalorder %s5428_s15, %s5848_s4 }
  0x81   :  { %p5434_p10 = pnand %p5432_p9, %p5429_p8 }
  0x83   :  { %5437 = shalt.err (!%p5434_p10)
}
  0x84   :  { %s5438_s16 = scalar_lea.vmem %s205_s7, 16  ;;  %s5442_s18 = scalar_lea.vmem %s205_s7, 32 }
  0x85   :  { %p5439_p11 = scmp.ne.s32.totalorder %s205_s7, %s5438_s16  ;;  %p5443_p12 = scmp.lt.s32.totalorder %s205_s7, %s205_s7 }
  0x86   :  { %p5444_p13 = scmp.lt.s32.totalorder %s5442_s18, %s5438_s16 }
  0x88   :  { %p5445_p0 = por %p5444_p13, %p5443_p12 }
  0x8a   :  { %p5446_p1 = pnand %p5445_p0, %p5439_p11 }
  0x8c   :  { %5449 = shalt.err (!%p5446_p1)
}
  0x8d   :  { %207 = dma.hbm_to_vmem [thread:$0]  %s5848_s4, 16, %s205_s7, [#allocation3]  }
  0x8e   :  { %s5624_s22 = smov [#allocation7]   ;;  %s5625_s23 = smov [#allocation8]  }
  0x8f   :  { %s228_s20 = sshll.u32 %s5624_s22, 4  ;;  %s240_s26 = sshll.u32 %s5625_s23, 4  ;;  %s229_s20 = int_to_ptr.vmem [resolvable:$true] %s228_s20  ;;  %s241_s26 = int_to_ptr.vmem [resolvable:$true] %s240_s26 }
  0x90   :  { %s5450_s28 = scalar_lea.hbm %s5868_s6, 16 }
  0x91   :  { %p5451_p2 = scmp.ne.s32.totalorder %s5868_s6, %s5450_s28  ;;  %p5454_p3 = scmp.lt.u32.totalorder %s5450_s28, %s5868_s6 }
  0x93   :  { %p5456_p4 = pnand %p5454_p3, %p5451_p2 }
  0x95   :  { %5459 = shalt.err (!%p5456_p4)
}
  0x96   :  { %s5460_s1 = scalar_lea.vmem %s229_s20, 16  ;;  %s5464_s2 = scalar_lea.vmem %s229_s20, 32 }
  0x97   :  { %p5461_p5 = scmp.ne.s32.totalorder %s229_s20, %s5460_s1  ;;  %p5465_p6 = scmp.lt.s32.totalorder %s229_s20, %s229_s20 }
  0x98   :  { %p5466_p7 = scmp.lt.s32.totalorder %s5464_s2, %s5460_s1 }
  0x9a   :  { %p5467_p8 = por %p5466_p7, %p5465_p6 }
  0x9c   :  { %p5468_p9 = pnand %p5467_p8, %p5461_p5 }
  0x9e   :  { %5471 = shalt.err (!%p5468_p9)
}
  0x9f   :  { %231 = dma.hbm_to_vmem [thread:$0]  %s5868_s6, 16, %s229_s20, [#allocation6]  }
  0xa0   :  { %s5472_s4 = scalar_lea.hbm %s5878_s25, 16 }
  0xa1   :  { %p5473_p10 = scmp.ne.s32.totalorder %s5878_s25, %s5472_s4  ;;  %p5476_p11 = scmp.lt.u32.totalorder %s5472_s4, %s5878_s25 }
  0xa3   :  { %p5478_p12 = pnand %p5476_p11, %p5473_p10 }
  0xa5   :  { %5481 = shalt.err (!%p5478_p12)
}
  0xa6   :  { %s5482_s7 = scalar_lea.vmem %s241_s26, 16  ;;  %s5486_s10 = scalar_lea.vmem %s241_s26, 32 }
  0xa7   :  { %p5483_p13 = scmp.ne.s32.totalorder %s241_s26, %s5482_s7  ;;  %p5487_p0 = scmp.lt.s32.totalorder %s241_s26, %s241_s26 }
  0xa8   :  { %p5488_p1 = scmp.lt.s32.totalorder %s5486_s10, %s5482_s7 }
  0xaa   :  { %p5489_p2 = por %p5488_p1, %p5487_p0 }
  0xac   :  { %p5490_p3 = pnand %p5489_p2, %p5483_p13 }
  0xae   :  { %5493 = shalt.err (!%p5490_p3)
}
  0xaf   :  { %243 = dma.hbm_to_vmem [thread:$0]  %s5878_s25, 16, %s241_s26, [#allocation9]  }
  0xb0   :  { %5560 = dma.done.wait [#allocation3], 16  }
  0xb1   :  { %5561 = vsyncadd [#allocation3], 4294967280 }
  0xb2   :  { %5562 = dma.done.wait [#allocation6], 32  }
  0xb3   :  { %5563 = vsyncadd [#allocation6], 4294967264 }
  0xb4   :  { %5564 = dma.done.wait [#allocation9], 16  }
  0xb5   :  { %5565 = vsyncadd [#allocation9], 4294967280  ;;  %v264_v0 = vlaneseq  ;;  %v5626_v1 = vmov 0   ;;  %v5627_v2 = vmov 0.0   ;;  %v263_v4 = vld [vmem:[%s5688_s14] sm:$0xff]  ;;  %vm452_vm2 = vcmask 1042432  }
  0xb6   :  { %5325 = vset.pattern.permute.xlu0 %v5626_v1  ;;  %4798 = vmatprep.subr.mxu0 %v5627_v2  ;;  %v4472_v5 = vld [vmem:[%s5643_s5] ss:$0 sm:$0xff]  ;;  %v439_v7 = vsub.f32 1.0, %v263_v4  ;;  %vm5628_vm3 = vmmov 0   ;;  %vm448_vm5 = vcmask 23552   ;;  %vm537_vm6 = vcmask 64512  }
  0xb7   :  { %v5922_v3 = vshrl.u32 %v264_v0, 7  ;;  %v4474_v6 = vld [vmem:[%s5648_s9] ss:$0 sm:$0xff]  ;;  %435 = vperm.xlu0 %5325, %v263_v4   ;;  %4800 = vmatprep.mubr.msk.f32.mxu0 %vm5628_vm3, %v5627_v2  ;;  %s6528_s5 = sld [smem:[#allocation27_spill]]  ;;  %vm809_vm7 = vcmask 15360   ;;  %vm816_vm8 = vcmask 1041408  }
  0xb8   :  { %v447_v11 = vld [vmem:[%s5693_s19] sm:$0x7]  ;;  %s6529_s9 = sld [smem:[#allocation21_spill]]  ;;  %vm925_vm9 = vcmask 261120   ;;  %s6532_s25 = sld [smem:[#allocation33_spill]]  ;;  %vm1295_vm11 = vcmask 130048  }
  0xb9   :  { %vm271_vm0 = vcmp.eq.s32.totalorder %v5922_v3, %v4472_v5  ;;  %vm279_vm1 = vcmp.eq.s32.totalorder %v5922_v3, %v4474_v6  ;;  %4799 = vmatpush3.msk.msra.mxu0 %vm452_vm2, %v447_v11  ;;  %v4478_v12 = vld [vmem:[%s5658_s17] ss:$0 sm:$0xff]  ;;  %s6530_s17 = sld [smem:[#allocation20_spill]]  ;;  %s6536_s14 = sld [smem:[#allocation19_spill]]  ;;  %vm4364_vm12 = vcmask 254976   ;;  %vm426_vm13 = vcmask 58368  }
  0xba   :  { %v5930_v8 = vsel %vm271_vm0, 1.0, %v5627_v2  ;;  %v5933_v9 = vsel %vm279_vm1, 1.0, %v5627_v2  ;;  %vm295_vm4 = vcmp.eq.s32.totalorder %v5922_v3, %v4478_v12  ;;  %v262_v15 = vld [vmem:[%s5683_s8] sm:$0xff]  ;;  %s6535_s8 = sld [smem:[#allocation31_spill]]  ;;  %s6538_s6 = sld [smem:[#allocation32_spill]] }
  0xbb   :  { %v5326_v10 = vpack.i.bf16 %v5933_v9, %v5930_v8  ;;  %442 = vperm.xlu0 %5325, %v439_v7   ;;  %v5944_v13 = vsel %vm295_vm4, 1.0, %v5627_v2  ;;  %v261_v16 = vld [vmem:[%s5678_s3] sm:$0xff]  ;;  %s6534_s3 = sld [smem:[#allocation28_spill]]  ;;  %s6539_s0 = sld [smem:[#allocation35_spill]] }
  0xbc   :  { %v5981_v29 = vld [vmem:[%s5663_s21] sm:$0xff]  ;;  %s6531_s21 = sld [smem:[#allocation22_spill]]  ;;  %s6540_s11 = sld [smem:[#allocation34_spill]] }
  0xbd   :  { %5327 = vxpose.xlu1.b32.start.end [1/1] (short) (narrow) %v5326_v10, 16  ;;  %v5984_v31 = vld [vmem:[%s5698_s24] ss:$0 sm:$0xff]  ;;  %v5339_v45 = vld [vmem:[%s6528_s5 + $0x8] sm:$0xff]   ;;  %v5340_v50 = vld [vmem:[%s6528_s5 + $0x10] sm:$0xff]   ;;  %s6537_s24 = sld [smem:[#allocation30_spill]] }
  0xbe   :  { %v5995_v36 = vld [vmem:[%s5673_s29] sm:$0x3]  ;;  %v5341_v54 = vld [vmem:[%s6528_s5 + $0x18] sm:$0xff]   ;;  %v5343_v6 = vld [vmem:[%s6528_s5 + $0x28] sm:$0xff]   ;;  %s6533_s29 = sld [smem:[#allocation29_spill]]  ;;  %s6542_s16 = sld [smem:[#allocation36_spill]] }
  0xbf   :  { %v5338_v41 = vld [vmem:[%s6528_s5] sm:$0xff]   ;;  %v6038_v62 = vld [vmem:[%s6530_s17 + $0x8] sm:$0xff]  ;;  %v5344_v12 = vld [vmem:[%s6528_s5 + $0x30] sm:$0xff]   ;;  %s6541_s15 = sld [smem:[#allocation37_spill]]  ;;  %s6543_s18 = sld [smem:[#allocation38_spill]] }
  0xc0   :  { %v6032_v57 = vld [vmem:[%s6529_s9] ss:$0 sm:$0xff]  ;;  %s6544_s22 = sld [smem:[#allocation39_spill]]  ;;  %s6545_s20 = sld [smem:[#allocation41_spill]] }
  0xc1   :  { %v6041_v63 = vld [vmem:[%s6530_s17] sm:$0xff]  ;;  %s6546_s23 = sld [smem:[#allocation40_spill]]  ;;  %s6547_s26 = sld [smem:[#allocation43_spill]] }
  0xc2   :  { %394 = vxpose.xlu1.b32.start.end [1/1] (short) (narrow) %v5944_v13, 16  ;;  %v5342_v0 = vld [vmem:[%s6528_s5 + $0x20] sm:$0xff]   ;;  %s6548_s28 = sld [smem:[#allocation42_spill]]  ;;  %s6549_s1 = sld [smem:[#allocation23_spill]] }
  0xc3   :  { %v6048_v5 = vld [vmem:[%s6531_s21] ss:$0 sm:$0xff]  ;;  %s6550_s2 = sld [smem:[#allocation25_spill]]  ;;  %s6551_s4 = sld [smem:[#allocation44_spill]] }
  0xc4   :  { %s6552_s7 = sld [smem:[#allocation24_spill]]  ;;  %s6553_s10 = sld [smem:[#allocation26_spill]] }
  0xc5   :  { %s6557_s9 = sld [smem:[#allocation46_spill]]  ;;  %s6558_s17 = sld [smem:[#allocation49_spill]] }
  0xc6   :  { %s6559_s21 = sld [smem:[#allocation48_spill]] }
 0x136   :  { %v5947_v14 = vpop.permute.xlu0 %435 }
 0x137   :  { %v438_v18 = vmul.f32 %v5947_v14, %v262_v15  ;;  %v5345_v15 = vld [vmem:[%s6528_s5 + $0x38] sm:$0xff]   ;;  %s6556_s5 = sld [smem:[#allocation47_spill]] }
 0x13a   :  { %v443_v17 = vpop.permute.xlu0 %442 }
 0x13b   :  { %v5952_v19 = vmul.f32 %v443_v17, %v261_v16  ;;  %v5346_v16 = vld [vmem:[%s6532_s25] sm:$0xff]   ;;  %v5347_v17 = vld [vmem:[%s6532_s25 + $0x8] sm:$0xff]  }
 0x13d   :  { %v5328_v20 = vpop.trf.xlu1  ;;  %v446_v23 = vadd.f32 %v5952_v19, %v438_v18 }
 0x13e   :  { %v5954_v21 = vunpack.i.h.bf16 %v5328_v20  ;;  %v5956_v22 = vunpack.i.l.bf16 %v5328_v20  ;;  %v5348_v20 = vld [vmem:[%s6533_s29] sm:$0xff]  }
 0x13f   :  { %4801 = vmatmul.mubr.msk.f32.vlgmr.msra.gmra.mrb[0].mxu0 %vm448_vm5, %v446_v23  ;;  %4803 = vmatprep.subr.mxu1 %v446_v23 }
 0x140   :  { %v5961_v24 = vsub.f32 %v5956_v22, %v5954_v21  ;;  %4804 = vmatpush3.msra.mxu1 %v446_v23  ;;  %4810 = vmatprep.mubr.msk.f32.mxu0 %vm537_vm6, %v5956_v22  ;;  %v5349_v23 = vld [vmem:[%s6533_s29 + $0x8] sm:$0xff]   ;;  %s6561_s29 = sld [smem:[#allocation52_spill]] }
 0x141   :  { %v5333_v25 = vpop.trf.xlu1 }
 0x142   :  { %v5964_v26 = vunpack.i.h.bf16 %v5333_v25  ;;  %v5966_v27 = vunpack.i.l.bf16 %v5333_v25  ;;  %4805 = vmatprep.mubr.msk.f32.mxu1 %vm537_vm6, %v5961_v24  ;;  %v4497_v25 = vld [vmem:[%s6534_s3] ss:$0 sm:$0xff]  ;;  %s5630_s3 = smov [#allocation11]  }
 0x144   :  { %v5974_v28 = vsub.f32 %v5966_v27, %v5964_v26 }
 0x145   :  { %v5987_v34 = vpop.trf.xlu1 }
 0x146   :  { %4806 = vmatmul.mubr.msk.f32.vlgmr.msra.gmra.mrb[0].mxu1 %vm537_vm6, %v5974_v28 }
 0x147   :  { %4815 = vmatprep.mubr.msk.f32.mxu1 %vm537_vm6, %v5954_v21 }
 0x149   :  { %v6008_v42 = vpop.trf.xlu1 }
 0x212   :  { %v522_v30 = vpop.f32.mrb[0].mxu0 }
 0x213   :  { %v526_v32 = vadd.f32 %v522_v30, %v5981_v29  ;;  %v4802_v33 = vpop.f32.mrb[1].mxu0 }
 0x215   :  { %v5990_v35 = vadd.f32 %v5984_v31, %v526_v32 }
 0x217   :  { %4808 = vmatprep.subr.mxu0 %v5990_v35  ;;  %4813 = vmatprep.subr.mxu1 %v5990_v35  ;;  %v1532_v18 = vpack.c.bf16 %v5990_v35, %v5990_v35 }
 0x218   :  { %4809 = vmatpush3.msra.mxu0 %v5990_v35  ;;  %4814 = vmatpush3.msra.mxu1 %v5990_v35 }
 0x219   :  { %v4807_v37 = vpop.f32.mrb[0].mxu1  ;;  %4811 = vmatmul.mubr.msk.f32.vlgmr.msra.gmra.mrb[2].mxu0 %vm537_vm6, %v5966_v27  ;;  %4816 = vmatmul.mubr.msk.f32.vlgmr.msra.gmra.mrb[2].mxu1 %vm537_vm6, %v5964_v26 }
 0x21a   :  { %v620_v38 = vmul.f32 %v4807_v37, %v4807_v37  ;;  %v610_v39 = vpop.f32.mrb[1].mxu1  ;;  %4820 = vmatprep.mubr.msk.f32.mxu0 %vm809_vm7, %v5987_v34  ;;  %4818 = vmatprep.subr.msk.mxu0 %vm816_vm8, %v5995_v36 }
 0x21b   :  { %v619_v40 = vmul.f32 %v610_v39, %v610_v39  ;;  %4819 = vmatpush3.msk.msra.mxu0 %vm816_vm8, %v5995_v36  ;;  %4823 = vmatprep.subr.bf16.mxu1 %v5627_v2 }
 0x21c   :  { %v624_v43 = vsel %vm448_vm5, %v620_v38, 0.0  ;;  %4824 = vmatpush3.bf16.msra.mxu1 %v5338_v41  ;;  %4827 = vmatprep.mubr.msk.bf16.mxu1 %vm5628_vm3, %v5627_v2 }
 0x21d   :  { %625 = vadd.xlane.f32.xlu1 %v624_v43  ;;  %v621_v44 = vsel %vm448_vm5, %v619_v40, 0.0  ;;  %4821 = vmatmul.mubr.msk.f32.vlgmr.msra.gmra.mrb[4].mxu0 %vm809_vm7, %v6008_v42  ;;  %v5350_v43 = vld [vmem:[%s6535_s8] sm:$0xff]  }
 0x21e   :  { %622 = vadd.xlane.f32.xlu0 %v621_v44  ;;  %4825 = vmatprep.subr.bf16.mxu1 %v5627_v2  ;;  %v5351_v44 = vld [vmem:[%s6535_s8 + $0x8] sm:$0xff]   ;;  %s4381_s8 = sshll.u32 %s5630_s3, 4  ;;  %s4382_s8 = int_to_ptr.vmem [resolvable:$true] %s4381_s8 }
 0x21f   :  { %4855 = vmatprep.subr.bf16.mxu0 %v5627_v2  ;;  %4859 = vmatprep.mubr.msk.bf16.mxu0 %vm5628_vm3, %v5627_v2  ;;  %p5499_p5 = scmp.lt.s32.totalorder %s4382_s8, %s4382_s8 }
 0x220   :  { %4826 = vmatpush3.bf16.msra.mxu1 %v5339_v45  ;;  %4856 = vmatpush3.bf16.msra.mxu0 %v5348_v20  ;;  %v4476_v45 = vld [vmem:[%s6536_s14] ss:$0 sm:$0xff]  ;;  %v5355_v20 = vld [vmem:[%s6532_s25 + $0x28] sm:$0xff]   ;;  %s5631_s14 = smov [#allocation10]  }
 0x221   :  { %4831 = vmatprep.subr.bf16.mxu1 %v5627_v2  ;;  %4857 = vmatprep.subr.bf16.mxu0 %v5627_v2  ;;  %vm287_vm10 = vcmp.eq.s32.totalorder %v5922_v3, %v4476_v45  ;;  %v5629_v3 = vmov 0.0|0.0  }
 0x224   :  { %4858 = vmatpush3.bf16.msra.mxu0 %v5349_v23 }
 0x225   :  { %4863 = vmatprep.subr.bf16.mxu0 %v5627_v2 }
 0x2aa   :  { %v626_v58 = vpop.xlane.xlu1 %625 }
 0x2ab   :  { %v623_v59 = vpop.xlane.xlu0 %622  ;;  %v635_v60 = vmul.f32 %v6032_v57, %v626_v58  ;;  %v5352_v58 = vld [vmem:[%s6532_s25 + $0x10] sm:$0xff]  }
 0x2ac   :  { %v634_v61 = vmul.f32 %v6032_v57, %v623_v59  ;;  %v4511_v59 = vld [vmem:[%s6538_s6] ss:$0 sm:$0xff]  ;;  %s5494_s6 = scalar_lea.vmem %s4382_s8, 256 }
 0x2ad   :  { %v637_v1 = vadd.f32 %v635_v60, %v6038_v62  ;;  %p5495_p4 = scmp.ne.s32.totalorder %s4382_s8, %s5494_s6  ;;  %p5500_p6 = scmp.lt.s32.totalorder %s5494_s6, %s5494_s6 }
 0x2ae   :  { %v636_v4 = vadd.f32 %v634_v61, %v6041_v63 }
 0x2af   :  { %v646_v7 = vadd.f32 %v6048_v5, %v637_v1  ;;  %p5501_p7 = por %p5500_p6, %p5499_p5 }
 0x2b0   :  { %v645_v10 = vadd.f32 %v6048_v5, %v636_v4 }
 0x2b1   :  { %p5502_p8 = pnand %p5501_p7, %p5495_p4 }
 0x2b2   :  { %v1037_v11 = vpack.c.bf16 %v646_v7, %v645_v10 }
 0x2ec   :  { %v4812_v46 = vpop.f32.mrb[2].mxu0  ;;  %v4817_v47 = vpop.f32.mrb[2].mxu1 }
 0x2ed   :  { %v719_v48 = vpop.f32.mrb[3].mxu0  ;;  %v800_v49 = vpop.f32.mrb[3].mxu1 }
 0x2ee   :  { %v912_v51 = vpack.c.bf16 %v4812_v46, %v719_v48  ;;  %v978_v52 = vpack.c.bf16 %v4817_v47, %v800_v49  ;;  %v6090_v46 = vsel %vm287_vm10, 1.0, %v5627_v2  ;;  %v4507_v47 = vld [vmem:[%s6537_s24] ss:$0 sm:$0xff]  ;;  %s4372_s24 = sshll.u32 %s5631_s14, 4  ;;  %s4373_s24 = int_to_ptr.vmem [resolvable:$true] %s4372_s24 }
 0x2ef   :  { %362 = vxpose.xlu0.b32.start.end [1/1] (short) (narrow) %v6090_v46, 8 }
 0x2f0   :  { %4828 = vmatmul.mubr.msk.bf16.vlgmr.msra.gmra.mrb[4].mxu1 %vm925_vm9, %v912_v51  ;;  %v4822_v53 = vpop.f32.mrb[4].mxu0 }
 0x2f1   :  { %4832 = vmatpush3.bf16.msra.mxu1 %v5340_v50  ;;  %4835 = vmatprep.mubr.msk.bf16.mxu1 %vm5628_vm3, %v5627_v2  ;;  %v886_v55 = vpop.f32.mrb[5].mxu0 }
 0x2f2   :  { %4833 = vmatprep.subr.bf16.mxu1 %v5627_v2  ;;  %v1096_v56 = vpack.c.bf16 %v4822_v53, %v886_v55 }
 0x2f5   :  { %4834 = vmatpush3.bf16.msra.mxu1 %v5341_v54 }
 0x2f6   :  { %4839 = vmatprep.subr.bf16.mxu1 %v5627_v2 }
 0x2fc   :  { %4836 = vmatmul.mubr.msk.bf16.vlgmr.msra.gmra.mrb[4].mxu1 %vm925_vm9, %v978_v52 }
 0x2fd   :  { %4840 = vmatpush3.bf16.msra.mxu1 %v5342_v0  ;;  %4843 = vmatprep.mubr.msk.bf16.mxu1 %vm5628_vm3, %v5627_v2 }
 0x2fe   :  { %4841 = vmatprep.subr.bf16.mxu1 %v5627_v2 }
 0x301   :  { %4842 = vmatpush3.bf16.msra.mxu1 %v5343_v6 }
 0x302   :  { %4847 = vmatprep.subr.bf16.mxu1 %v5627_v2 }
 0x308   :  { %4844 = vmatmul.mubr.msk.bf16.vlgmr.msra.gmra.mrb[4].mxu1 %vm925_vm9, %v1037_v11  ;;  %v5353_v11 = vld [vmem:[%s6532_s25 + $0x18] sm:$0xff]  }
 0x309   :  { %4848 = vmatpush3.bf16.msra.mxu1 %v5344_v12  ;;  %4851 = vmatprep.mubr.msk.bf16.mxu1 %vm5628_vm3, %v5627_v2 }
 0x30a   :  { %4849 = vmatprep.subr.bf16.mxu1 %v5627_v2 }
 0x30d   :  { %4850 = vmatpush3.bf16.msra.mxu1 %v5345_v15  ;;  %v5354_v15 = vld [vmem:[%s6532_s25 + $0x20] sm:$0xff]  }
 0x30e   :  { %4890 = vmatprep.subr.bf16.mxu1 %v5627_v2 }
 0x314   :  { %4852 = vmatmul.mubr.msk.bf16.vlgmr.msra.gmra.mrb[4].mxu1 %vm925_vm9, %v1096_v56 }
 0x315   :  { %4891 = vmatpush3.bf16.msra.mxu1 %v5346_v16  ;;  %4894 = vmatprep.mubr.msk.bf16.mxu1 %vm5628_vm3, %v5627_v2 }
 0x316   :  { %4892 = vmatprep.subr.bf16.mxu1 %v5627_v2 }
 0x319   :  { %4893 = vmatpush3.bf16.msra.mxu1 %v5347_v17 }
 0x31a   :  { %4898 = vmatprep.subr.bf16.mxu1 %v5627_v2 }
 0x31c   :  { %4895 = vmatmul.mubr.msk.bf16.vlgmr.msra.gmra.mrb[8].mxu1 %vm925_vm9, %v1532_v18 }
 0x31d   :  { %4902 = vmatprep.mubr.msk.bf16.mxu1 %vm5628_vm3, %v5627_v2  ;;  %4899 = vmatpush3.bf16.msra.mxu1 %v5352_v58 }
 0x31e   :  { %4900 = vmatprep.subr.bf16.mxu1 %v5627_v2 }
 0x321   :  { %4901 = vmatpush3.bf16.msra.mxu1 %v5353_v11 }
 0x322   :  { %4906 = vmatprep.subr.bf16.mxu1 %v5627_v2 }
 0x36f   :  { %v6119_v10 = vpop.trf.xlu0 }
 0x3e7   :  { %v1146_v30 = vpop.f32.mrb[4].mxu1 }
 0x3e8   :  { %v5197_v32 = vadd.f32 %v4497_v25, %v1146_v30  ;;  %v4853_v33 = vpop.f32.mrb[5].mxu1 }
 0x3e9   :  { %v1149_v35 = vpop.f32.mrb[6].mxu1  ;;  %v5356_v33 = vld [vmem:[%s6532_s25 + $0x30] sm:$0xff]  }
 0x3ea   :  { %v5198_v37 = vadd.f32 %v4497_v25, %v1149_v35  ;;  %v4854_v38 = vpop.f32.mrb[7].mxu1  ;;  %v1155_v39 = vmax.f32 %v5197_v32, 0.0  ;;  %v5357_v35 = vld [vmem:[%s6532_s25 + $0x38] sm:$0xff]   ;;  %s6560_s25 = sld [smem:[#allocation51_spill]] }
 0x3eb   :  { %v5358_v38 = vld [vmem:[%s6539_s0] sm:$0xff]  }
 0x3ec   :  { %v1156_v40 = vmax.f32 %v5198_v37, 0.0 }
 0x3ee   :  { %v1157_v41 = vpack.c.bf16 %v1156_v40, %v1155_v39  ;;  %v5359_v39 = vld [vmem:[%s6539_s0 + $0x8] sm:$0xff]   ;;  %v4522_v40 = vld [vmem:[%s6540_s11] ss:$0 sm:$0xff] }
 0x3f0   :  { %4860 = vmatmul.mubr.msk.bf16.vlgmr.msra.gmra.mrb[8].mxu0 %vm925_vm9, %v1157_v41 }
 0x3f1   :  { %4867 = vmatprep.mubr.msk.bf16.mxu0 %vm5628_vm3, %v5627_v2  ;;  %4864 = vmatpush3.bf16.msra.mxu0 %v5350_v43 }
 0x3f2   :  { %4865 = vmatprep.subr.bf16.mxu0 %v5627_v2 }
 0x3f5   :  { %4866 = vmatpush3.bf16.msra.mxu0 %v5351_v44 }
 0x3f6   :  { %5182 = vmatprep.subr.bf16.mxu0 %v5629_v3 }
 0x4c3   :  { %v1218_v48 = vpop.f32.mrb[8].mxu0 }
 0x4c4   :  { %v1219_v49 = vadd.f32 %v4507_v47, %v1218_v48  ;;  %v4861_v50 = vpop.f32.mrb[9].mxu0 }
 0x4c5   :  { %v1221_v51 = vpop.f32.mrb[10].mxu0  ;;  %v5360_v50 = vld [vmem:[%s6541_s15] sm:$0xff]  }
 0x4c6   :  { %v1222_v52 = vadd.f32 %v4507_v47, %v1221_v51  ;;  %v4862_v53 = vpop.f32.mrb[11].mxu0  ;;  %v1225_v54 = vmax.f32 %v1219_v49, 0.0  ;;  %v5361_v51 = vld [vmem:[%s6541_s15 + $0x8] sm:$0xff]  }
 0x4c8   :  { %v1226_v55 = vmax.f32 %v1222_v52, 0.0  ;;  %v4532_v52 = vld [vmem:[%s6542_s16] ss:$0 sm:$0xff] }
 0x4ca   :  { %v1227_v56 = vpack.c.bf16 %v1226_v55, %v1225_v54 }
 0x4cc   :  { %4868 = vmatmul.mubr.msk.bf16.vlgmr.msra.gmra.mrb[12].mxu0 %vm925_vm9, %v1227_v56 }
 0x4cd   :  { %4875 = vmatprep.mubr.msk.f32.mxu0 %vm5628_vm3, %v5627_v2 }
 0x59f   :  { %v1288_v60 = vpop.f32.mrb[12].mxu0 }
 0x5a0   :  { %v4869_v61 = vpop.f32.mrb[13].mxu0  ;;  %v6101_v1 = vadd.f32 %v4511_v59, %v1288_v60 }
 0x5a1   :  { %v1291_v0 = vpop.f32.mrb[14].mxu0  ;;  %v4536_v61 = vld [vmem:[%s6543_s18] ss:$0 sm:$0xff] }
 0x5a2   :  { %v6103_v4 = vadd.f32 %v4511_v59, %v1291_v0  ;;  %v4870_v6 = vpop.f32.mrb[15].mxu0 }
 0x5a4   :  { %v6107_v7 = vpack.c.bf16 %v6103_v4, %v6101_v1 }
 0x5a6   :  { %5184 = vmatpush3.bf16.msra.mxu0 %v6107_v7 }
 0x5a7   :  { %5185 = vmatprep.subr.bf16.mxu0 %v5629_v3 }
 0x5a9   :  { %4876 = vmatmul.mubr.msk.f32.vlgmr.msra.gmra.mrb[6].mxu0 %vm1295_vm11, %v5930_v8 }
 0x5aa   :  { %5187 = vmatpush3.bf16.msra.mxu0 %v6107_v7  ;;  %4882 = vmatprep.mubr.msk.f32.mxu0 %vm5628_vm3, %v5627_v2 }
 0x5ab   :  { %4885 = vmatprep.subr.mxu0 %v5627_v2 }
 0x5ad   :  { %4883 = vmatmul.mubr.msk.f32.vlgmr.msra.gmra.mrb[16].mxu0 %vm1295_vm11, %v5933_v9 }
 0x5ae   :  { %4886 = vmatpush3.msk.msra.mxu0 %vm816_vm8, %v5995_v36  ;;  %4887 = vmatprep.mubr.msk.f32.mxu0 %vm5628_vm3, %v5627_v2 }
 0x5af   :  { %4922 = vmatprep.subr.bf16.mxu0 %v5627_v2 }
 0x5b1   :  { %4888 = vmatmul.mubr.msk.f32.vlgmr.msra.gmra.mrb[18].mxu0 %vm809_vm7, %v6119_v10 }
 0x5b2   :  { %4926 = vmatprep.mubr.msk.bf16.mxu0 %vm5628_vm3, %v5627_v2  ;;  %4923 = vmatpush3.bf16.msra.mxu0 %v5358_v38  ;;  %v5368_v38 = vld [vmem:[%s6545_s20] sm:$0xff]  }
 0x5b3   :  { %4924 = vmatprep.subr.bf16.mxu0 %v5627_v2 }
 0x5b6   :  { %4925 = vmatpush3.bf16.msra.mxu0 %v5359_v39  ;;  %v5369_v39 = vld [vmem:[%s6545_s20 + $0x8] sm:$0xff]  }
 0x5b7   :  { %4930 = vmatprep.subr.bf16.mxu0 %v5627_v2 }
 0x67c   :  { %v1365_v12 = vpop.f32.mrb[6].mxu0 }
 0x67d   :  { %v1595_v16 = vpack.c.bf16 %v1365_v12, %v1365_v12  ;;  %v4877_v17 = vpop.f32.mrb[7].mxu0 }
 0x67e   :  { %v5363_v17 = vld [vmem:[%s6544_s22 + $0x8] sm:$0xff]  }
 0x67f   :  { %4903 = vmatmul.mubr.msk.bf16.vlgmr.msra.gmra.mrb[8].mxu1 %vm925_vm9, %v1595_v16  ;;  %v5362_v16 = vld [vmem:[%s6544_s22] sm:$0xff]  }
 0x680   :  { %4907 = vmatpush3.bf16.msra.mxu1 %v5354_v15  ;;  %v1438_v18 = vpop.f32.mrb[16].mxu0  ;;  %4910 = vmatprep.mubr.msk.bf16.mxu1 %vm5628_vm3, %v5627_v2 }
 0x681   :  { %4908 = vmatprep.subr.bf16.mxu1 %v5627_v2  ;;  %v4884_v23 = vpop.f32.mrb[17].mxu0  ;;  %v1652_v32 = vpack.c.bf16 %v1438_v18, %v1438_v18  ;;  %v5364_v18 = vld [vmem:[%s6544_s22 + $0x10] sm:$0xff]  }
 0x682   :  { %v5366_v23 = vld [vmem:[%s6544_s22 + $0x20] sm:$0xff]  }
 0x684   :  { %4909 = vmatpush3.bf16.msra.mxu1 %v5355_v20  ;;  %v1511_v25 = vpop.f32.mrb[18].mxu0 }
 0x685   :  { %4914 = vmatprep.subr.bf16.mxu1 %v5627_v2  ;;  %v4889_v30 = vpop.f32.mrb[19].mxu0  ;;  %v1709_v37 = vpack.c.bf16 %v1511_v25, %v1511_v25 }
 0x68b   :  { %4911 = vmatmul.mubr.msk.bf16.vlgmr.msra.gmra.mrb[8].mxu1 %vm925_vm9, %v1652_v32 }
 0x68c   :  { %4915 = vmatpush3.bf16.msra.mxu1 %v5356_v33  ;;  %4918 = vmatprep.mubr.msk.bf16.mxu1 %vm5628_vm3, %v5627_v2  ;;  %v5367_v33 = vld [vmem:[%s6544_s22 + $0x28] sm:$0xff]  }
 0x68d   :  { %4916 = vmatprep.subr.bf16.mxu1 %v5627_v2 }
 0x690   :  { %4917 = vmatpush3.bf16.msra.mxu1 %v5357_v35 }
 0x691   :  { %4974 = vmatprep.subr.bf16.mxu1 %v5627_v2 }
 0x697   :  { %4919 = vmatmul.mubr.msk.bf16.vlgmr.msra.gmra.mrb[8].mxu1 %vm925_vm9, %v1709_v37 }
 0x698   :  { %4978 = vmatprep.mubr.msk.bf16.mxu1 %vm5628_vm3, %v5627_v2  ;;  %4975 = vmatpush3.bf16.msra.mxu1 %v5368_v38 }
 0x699   :  { %4976 = vmatprep.subr.bf16.mxu1 %v5627_v2 }
 0x69c   :  { %4977 = vmatpush3.bf16.msra.mxu1 %v5369_v39 }
 0x69d   :  { %4982 = vmatprep.subr.bf16.mxu1 %v5627_v2 }
 0x76a   :  { %v1759_v41 = vpop.f32.mrb[8].mxu1 }
 0x76b   :  { %v5199_v43 = vadd.f32 %v4522_v40, %v1759_v41  ;;  %v4920_v44 = vpop.f32.mrb[9].mxu1  ;;  %v4545_v40 = vld [vmem:[%s6546_s23] ss:$0 sm:$0xff] }
 0x76c   :  { %v1762_v45 = vpop.f32.mrb[10].mxu1 }
 0x76d   :  { %v1766_v47 = vmax.f32 %v5199_v43, 0.0  ;;  %v4921_v48 = vpop.f32.mrb[11].mxu1 }
 0x76f   :  { %v1767_v49 = vpack.c.bf16 %v1766_v47, %v1766_v47 }
 0x771   :  { %4927 = vmatmul.mubr.msk.bf16.vlgmr.msra.gmra.mrb[20].mxu0 %vm925_vm9, %v1767_v49 }
 0x772   :  { %4934 = vmatprep.mubr.msk.bf16.mxu0 %vm5628_vm3, %v5627_v2  ;;  %4931 = vmatpush3.bf16.msra.mxu0 %v5360_v50  ;;  %v5370_v50 = vld [vmem:[%s6547_s26] sm:$0xff]  }
 0x773   :  { %4932 = vmatprep.subr.bf16.mxu0 %v5627_v2 }
 0x776   :  { %4933 = vmatpush3.bf16.msra.mxu0 %v5361_v51  ;;  %v5371_v51 = vld [vmem:[%s6547_s26 + $0x8] sm:$0xff]  }
 0x777   :  { %4938 = vmatprep.subr.mxu0 %v5627_v2 }
 0x844   :  { %v1828_v53 = vpop.f32.mrb[20].mxu0 }
 0x845   :  { %v1829_v54 = vadd.f32 %v4532_v52, %v1828_v53  ;;  %v4928_v55 = vpop.f32.mrb[21].mxu0  ;;  %v4552_v52 = vld [vmem:[%s6548_s28] ss:$0 sm:$0xff] }
 0x846   :  { %v1831_v56 = vpop.f32.mrb[22].mxu0 }
 0x847   :  { %v1834_v58 = vmax.f32 %v1829_v54, 0.0  ;;  %v4929_v59 = vpop.f32.mrb[23].mxu0 }
 0x849   :  { %v1835_v60 = vpack.c.bf16 %v1834_v58, %v1834_v58 }
 0x84b   :  { %4935 = vmatmul.mubr.msk.bf16.vlgmr.msra.gmra.mrb[24].mxu0 %vm925_vm9, %v1835_v60  ;;  %v5372_v60 = vld [vmem:[%s6549_s1] sm:$0xff]  }
 0x84c   :  { %4940 = vmatprep.mubr.msk.f32.mxu0 %vm5628_vm3, %v5627_v2 }
 0x91e   :  { %v1896_v0 = vpop.f32.mrb[24].mxu0 }
 0x91f   :  { %v6166_v6 = vadd.f32 %v4536_v61, %v1896_v0  ;;  %v4936_v11 = vpop.f32.mrb[25].mxu0  ;;  %v5373_v0 = vld [vmem:[%s6549_s1 + $0x8] sm:$0xff]  }
 0x920   :  { %v1899_v12 = vpop.f32.mrb[26].mxu0 }
 0x921   :  { %v4937_v15 = vpop.f32.mrb[27].mxu0  ;;  %4939 = vmatpush3.msra.mxu0 %v6166_v6  ;;  %v6223_v11 = vadd.f32 %v6166_v6, %v5981_v29  ;;  %v5375_v29 = vld [vmem:[%s6550_s2 + $0x8] sm:$0xff]   ;;  %v4556_v6 = vld [vmem:[%s6551_s4] ss:$0 sm:$0xff] }
 0x922   :  { %4941 = vmatmul.mubr.msk.f32.vlgmr.msra.gmra.mrb[28].mxu0 %vm537_vm6, %v6090_v46  ;;  %5188 = vmatprep.subr.bf16.mxu0 %v5629_v3  ;;  %v5374_v15 = vld [vmem:[%s6550_s2] sm:$0xff]  }
 0x923   :  { %5190 = vmatpush3.bf16.msra.mxu0 %v6107_v7  ;;  %4947 = vmatprep.mubr.msk.f32.mxu0 %vm5628_vm3, %v5627_v2  ;;  %v2061_v7 = vpack.c.bf16 %v5995_v36, %v5995_v36  ;;  %v2383_v12 = vpack.c.bf16 %v6223_v11, %v6223_v11 }
 0x924   :  { %4950 = vmatprep.subr.bf16.mxu0 %v5627_v2 }
 0x926   :  { %4948 = vmatmul.mubr.msk.f32.vlgmr.msra.gmra.mrb[30].mxu0 %vm1295_vm11, %v5944_v13  ;;  %v5365_v13 = vld [vmem:[%s6544_s22 + $0x18] sm:$0xff]  }
 0x927   :  { %4951 = vmatpush3.bf16.msra.mxu0 %v5362_v16  ;;  %4954 = vmatprep.mubr.msk.bf16.mxu0 %vm5628_vm3, %v5627_v2 }
 0x928   :  { %4952 = vmatprep.subr.bf16.mxu0 %v5627_v2 }
 0x92b   :  { %4953 = vmatpush3.bf16.msra.mxu0 %v5363_v17 }
 0x92c   :  { %4958 = vmatprep.subr.bf16.mxu0 %v5627_v2 }
 0x92e   :  { %4955 = vmatmul.mubr.msk.bf16.vlgmr.msra.gmra.mrb[32].mxu0 %vm925_vm9, %v2061_v7 }
 0x92f   :  { %4959 = vmatpush3.bf16.msra.mxu0 %v5364_v18  ;;  %4962 = vmatprep.mubr.msk.bf16.mxu0 %vm5628_vm3, %v5627_v2 }
 0x930   :  { %4960 = vmatprep.subr.bf16.mxu0 %v5627_v2 }
 0x933   :  { %4961 = vmatpush3.bf16.msra.mxu0 %v5365_v13 }
 0x934   :  { %4966 = vmatprep.subr.bf16.mxu0 %v5627_v2 }
 0x9f5   :  { %v1971_v20 = vpop.f32.mrb[28].mxu0 }
 0x9f6   :  { %v2124_v25 = vpack.c.bf16 %v1971_v20, %v1971_v20  ;;  %v4942_v30 = vpop.f32.mrb[29].mxu0 }
 0x9f8   :  { %4963 = vmatmul.mubr.msk.bf16.vlgmr.msra.gmra.mrb[32].mxu0 %vm925_vm9, %v2124_v25  ;;  %v6243_v25 = vld [vmem:[%s6552_s7] ss:$0 sm:$0xff] }
 0x9f9   :  { %4967 = vmatpush3.bf16.msra.mxu0 %v5366_v23  ;;  %v2044_v32 = vpop.f32.mrb[30].mxu0  ;;  %4970 = vmatprep.mubr.msk.bf16.mxu0 %vm5628_vm3, %v5627_v2 }
 0x9fa   :  { %4968 = vmatprep.subr.bf16.mxu0 %v5627_v2  ;;  %v4949_v35 = vpop.f32.mrb[31].mxu0  ;;  %v2181_v37 = vpack.c.bf16 %v2044_v32, %v2044_v32 }
 0x9fd   :  { %4969 = vmatpush3.bf16.msra.mxu0 %v5367_v33 }
 0x9fe   :  { %4998 = vmatprep.subr.bf16.mxu0 %v5627_v2 }
 0xa04   :  { %4971 = vmatmul.mubr.msk.bf16.vlgmr.msra.gmra.mrb[32].mxu0 %vm925_vm9, %v2181_v37 }
 0xa05   :  { %5002 = vmatprep.mubr.msk.bf16.mxu0 %vm5628_vm3, %v5627_v2  ;;  %4999 = vmatpush3.bf16.msra.mxu0 %v5374_v15 }
 0xa06   :  { %5000 = vmatprep.subr.bf16.mxu0 %v5627_v2 }
 0xa09   :  { %5001 = vmatpush3.bf16.msra.mxu0 %v5375_v29 }
 0xa0a   :  { %5016 = vmatprep.subr.mxu0 %v5627_v2 }
 0xad7   :  { %v2231_v41 = vpop.f32.mrb[32].mxu0 }
 0xad8   :  { %v5200_v43 = vadd.f32 %v4545_v40, %v2231_v41  ;;  %v4972_v44 = vpop.f32.mrb[33].mxu0  ;;  %v6251_v40 = vld [vmem:[%s6553_s10] ss:$0 sm:$0xff] }
 0xad9   :  { %v2234_v45 = vpop.f32.mrb[34].mxu0 }
 0xada   :  { %v2238_v47 = vmax.f32 %v5200_v43, 0.0  ;;  %v4973_v48 = vpop.f32.mrb[35].mxu0 }
 0xadc   :  { %v2239_v49 = vpack.c.bf16 %v2238_v47, %v2238_v47 }
 0xade   :  { %4979 = vmatmul.mubr.msk.bf16.vlgmr.msra.gmra.mrb[12].mxu1 %vm925_vm9, %v2239_v49 }
 0xadf   :  { %4986 = vmatprep.mubr.msk.bf16.mxu1 %vm5628_vm3, %v5627_v2  ;;  %4983 = vmatpush3.bf16.msra.mxu1 %v5370_v50 }
 0xae0   :  { %4984 = vmatprep.subr.bf16.mxu1 %v5627_v2 }
 0xae3   :  { %4985 = vmatpush3.bf16.msra.mxu1 %v5371_v51 }
 0xae4   :  { %4990 = vmatprep.subr.bf16.mxu1 %v5627_v2 }
 0xbb1   :  { %v2300_v53 = vpop.f32.mrb[12].mxu1 }
 0xbb2   :  { %v2301_v54 = vadd.f32 %v4552_v52, %v2300_v53  ;;  %v4980_v55 = vpop.f32.mrb[13].mxu1 }
 0xbb3   :  { %v2303_v56 = vpop.f32.mrb[14].mxu1 }
 0xbb4   :  { %v2306_v58 = vmax.f32 %v2301_v54, 0.0  ;;  %v4981_v59 = vpop.f32.mrb[15].mxu1  ;;  %v2662_v54 = vld [vmem:[%s5693_s19] sm:$0x7]  ;;  %s6554_s19 = sld [smem:[#allocation45_spill]] }
 0xbb6   :  { %v2307_v61 = vpack.c.bf16 %v2306_v58, %v2306_v58 }
 0xbb8   :  { %4987 = vmatmul.mubr.msk.bf16.vlgmr.msra.gmra.mrb[16].mxu1 %vm925_vm9, %v2307_v61 }
 0xbb9   :  { %4991 = vmatpush3.bf16.msra.mxu1 %v5372_v60  ;;  %4994 = vmatprep.mubr.msk.bf16.mxu1 %vm5628_vm3, %v5627_v2 }
 0xbba   :  { %4992 = vmatprep.subr.bf16.mxu1 %v5627_v2 }
 0xbbd   :  { %4993 = vmatpush3.bf16.msra.mxu1 %v5373_v0 }
 0xbbe   :  { %5006 = vmatprep.subr.mxu1 %v5627_v2 }
 0xbc0   :  { %4995 = vmatmul.mubr.msk.bf16.vlgmr.msra.gmra.mrb[20].mxu1 %vm925_vm9, %v2383_v12 }
 0xbc1   :  { %5008 = vmatprep.mubr.msk.f32.mxu1 %vm5628_vm3, %v5627_v2 }
 0xc8b   :  { %v2368_v16 = vpop.f32.mrb[16].mxu1 }
 0xc8c   :  { %v2369_v17 = vadd.f32 %v4556_v6, %v2368_v16  ;;  %v4988_v7 = vpop.f32.mrb[17].mxu1  ;;  %v5378_v6 = vld [vmem:[%s6554_s19 + $0x10] sm:$0xff]  }
 0xc8d   :  { %v2371_v18 = vpop.f32.mrb[18].mxu1 }
 0xc8e   :  { %v6238_v13 = vadd.f32 %v2369_v17, %v5995_v36  ;;  %v4989_v20 = vpop.f32.mrb[19].mxu1  ;;  %v427_v36 = vsel %vm426_vm13, %v6090_v46, 0.0 }
 0xc8f   :  { %428 = vadd.xlane.f32.xlu1 %v427_v36  ;;  %v6332_v36 = vadd.f32 %v6101_v1, %v6041_v63  ;;  %v5383_v63 = vld [vmem:[%s6554_s19 + $0x38] sm:$0xff]  }
 0xc90   :  { %v4075_v23 = vadd.f32 %v6238_v13, %v6238_v13 }
 0xc92   :  { %4365 = vst.msk [vmem:[#allocation13] sm:$0x3] %vm4364_vm12, %v4075_v23  ;;  %v5379_v23 = vld [vmem:[%s6554_s19 + $0x18] sm:$0xff]  }
 0xc93   :  { %v2433_v30 = vpop.f32.mrb[20].mxu1 }
 0xc94   :  { %v2445_v32 = vadd.f32 %v6243_v25, %v2433_v30  ;;  %v4996_v33 = vpop.f32.mrb[21].mxu1 }
 0xc95   :  { %v2436_v35 = vpop.f32.mrb[22].mxu1  ;;  %v5380_v33 = vld [vmem:[%s6554_s19 + $0x20] sm:$0xff]  }
 0xc96   :  { %v2446_v37 = vmax.f32 %v2445_v32, 0.0  ;;  %v4997_v38 = vpop.f32.mrb[23].mxu1 }
 0xc98   :  { %v2447_v39 = vpack.c.bf16 %v2446_v37, %v2446_v37  ;;  %v6323_v37 = vadd.f32 %v6103_v4, %v6038_v62 }
 0xc9a   :  { %5003 = vmatmul.mubr.msk.bf16.vlgmr.msra.gmra.mrb[36].mxu0 %vm925_vm9, %v2447_v39  ;;  %v5381_v39 = vld [vmem:[%s6554_s19 + $0x28] sm:$0xff]  }
 0xc9b   :  { %5018 = vmatprep.mubr.msk.f32.mxu0 %vm5628_vm3, %v5627_v2  ;;  %5017 = vmatpush3.msk.msra.mxu0 %vm452_vm2, %v2662_v54 }
 0xd1c   :  { %v429_v48 = vpop.xlane.xlu1 %428 }
 0xd1d   :  { %v430_v49 = vmax.f32 %v429_v48, 1.0  ;;  %v5387_v48 = vld [vmem:[%s6556_s5 + $0x8] sm:$0xff]  }
 0xd1f   :  { %5404 = vrcp.f32 %v430_v49  ;;  %v4588_v49 = vld [vmem:[%s6557_s9] ss:$0 sm:$0xff] }
 0xd29   :  { %v6259_v50 = vpop.eup %5404 }
 0xd6d   :  { %v2508_v41 = vpop.f32.mrb[36].mxu0 }
 0xd6e   :  { %v2509_v43 = vadd.f32 %v6251_v40, %v2508_v41  ;;  %v5004_v44 = vpop.f32.mrb[37].mxu0 }
 0xd6f   :  { %v2511_v45 = vpop.f32.mrb[38].mxu0 }
 0xd70   :  { %v5005_v47 = vpop.f32.mrb[39].mxu0  ;;  %5007 = vmatpush3.msra.mxu1 %v2509_v43 }
 0xd71   :  { %5009 = vmatmul.mubr.msk.f32.vlgmr.msra.gmra.mrb[24].mxu1 %vm537_vm6, %v6090_v46  ;;  %5011 = vmatprep.subr.mxu1 %v5627_v2  ;;  %v5386_v47 = vld [vmem:[%s6556_s5] sm:$0xff]  }
 0xd72   :  { %5013 = vmatprep.mubr.msk.f32.mxu1 %vm5628_vm3, %v5627_v2 }
 0xe44   :  { %v2580_v51 = vpop.f32.mrb[24].mxu1 }
 0xe45   :  { %v2584_v52 = vmul.f32 %v6259_v50, %v2580_v51  ;;  %v5010_v53 = vpop.f32.mrb[25].mxu1 }
 0xe47   :  { %5012 = vmatpush3.msk.msra.mxu1 %vm816_vm8, %v2584_v52 }
 0xe48   :  { %5014 = vmatmul.mubr.msk.f32.vlgmr.msra.gmra.mrb[26].mxu1 %vm809_vm7, %v6119_v10 }
 0xe49   :  { %5023 = vmatprep.mubr.msk.f32.mxu1 %vm537_vm6, %v5961_v24 }
 0xf1b   :  { %v2654_v55 = vpop.f32.mrb[26].mxu1 }
 0xf1c   :  { %v2658_v56 = vsub.f32 %v2509_v43, %v2654_v55  ;;  %v5015_v58 = vpop.f32.mrb[27].mxu1  ;;  %v5382_v43 = vld [vmem:[%s6554_s19 + $0x30] sm:$0xff]  }
 0xf1e   :  { %2659 = vst.msk [vmem:[%s5898_s12] sm:$0xff] %vm448_vm5, %v2658_v56  ;;  %v2660_v59 = vmul.f32 %v2658_v56, %v5947_v14  ;;  %s6555_s12 = sld [smem:[#allocation50_spill]] }
 0xf20   :  { %v2661_v60 = vadd.f32 %v2660_v59, %v5952_v19 }
 0xf22   :  { %5019 = vmatmul.mubr.msk.f32.vlgmr.msra.gmra.mrb[40].mxu0 %vm448_vm5, %v2661_v60  ;;  %5021 = vmatprep.subr.mxu1 %v2661_v60 }
 0xf23   :  { %5022 = vmatpush3.msra.mxu1 %v2661_v60  ;;  %5028 = vmatprep.mubr.msk.f32.mxu0 %vm537_vm6, %v5956_v22 }
 0xf24   :  { %5024 = vmatmul.mubr.msk.f32.vlgmr.msra.gmra.mrb[28].mxu1 %vm537_vm6, %v5974_v28  ;;  %v5377_v28 = vld [vmem:[%s6554_s19 + $0x8] sm:$0xff]   ;;  %v5384_v1 = vld [vmem:[%s6555_s12] sm:$0xff]  }
 0xf25   :  { %5033 = vmatprep.mubr.msk.f32.mxu1 %vm537_vm6, %v5954_v21 }
 0xff5   :  { %v2735_v24 = vpop.f32.mrb[40].mxu0 }
 0xff6   :  { %v2739_v61 = vadd.f32 %v2735_v24, %v6223_v11  ;;  %v5020_v0 = vpop.f32.mrb[41].mxu0  ;;  %v5388_v24 = vld [vmem:[%s6558_s17] sm:$0xff]  }
 0xff7   :  { %v5025_v14 = vpop.f32.mrb[28].mxu1  ;;  %v4598_v0 = vld [vmem:[%s6559_s21] ss:$0 sm:$0xff] }
 0xff8   :  { %v6282_v19 = vadd.f32 %v5984_v31, %v2739_v61  ;;  %v2814_v12 = vpop.f32.mrb[29].mxu1  ;;  %v2824_v22 = vmul.f32 %v5025_v14, %v5025_v14  ;;  %v5389_v61 = vld [vmem:[%s6558_s17 + $0x8] sm:$0xff]  }
 0xff9   :  { %v2823_v15 = vmul.f32 %v2814_v12, %v2814_v12 }
 0xffa   :  { %5026 = vmatprep.subr.mxu0 %v6282_v19  ;;  %5031 = vmatprep.subr.mxu1 %v6282_v19  ;;  %v3705_v45 = vpack.c.bf16 %v6282_v19, %v6282_v19 }
 0xffb   :  { %5027 = vmatpush3.msra.mxu0 %v6282_v19  ;;  %5032 = vmatpush3.msra.mxu1 %v6282_v19  ;;  %v2825_v21 = vsel %vm448_vm5, %v2823_v15, 0.0 }
 0xffc   :  { %5029 = vmatmul.mubr.msk.f32.vlgmr.msra.gmra.mrb[42].mxu0 %vm537_vm6, %v5966_v27  ;;  %5034 = vmatmul.mubr.msk.f32.vlgmr.msra.gmra.mrb[30].mxu1 %vm537_vm6, %v5964_v26  ;;  %v2828_v26 = vsel %vm448_vm5, %v2824_v22, 0.0  ;;  %v5376_v27 = vld [vmem:[%s6554_s19] sm:$0xff]  }
 0xffd   :  { %5036 = vmatprep.subr.msk.mxu0 %vm816_vm8, %v6238_v13  ;;  %2826 = vadd.xlane.f32.xlu1 %v2825_v21 }
 0xffe   :  { %5037 = vmatpush3.msk.msra.mxu0 %vm816_vm8, %v6238_v13  ;;  %5038 = vmatprep.mubr.msk.f32.mxu0 %vm809_vm7, %v5987_v34 }
 0xfff   :  { %5041 = vmatprep.subr.bf16.mxu1 %v5627_v2  ;;  %5045 = vmatprep.mubr.msk.bf16.mxu1 %vm5628_vm3, %v5627_v2 }
0x1000   :  { %5039 = vmatmul.mubr.msk.f32.vlgmr.msra.gmra.mrb[44].mxu0 %vm809_vm7, %v6008_v42  ;;  %5073 = vmatprep.subr.bf16.mxu0 %v5627_v2 }
0x1001   :  { %2829 = vadd.xlane.f32.xlu1 %v2828_v26  ;;  %5077 = vmatprep.mubr.msk.bf16.mxu0 %vm5628_vm3, %v5627_v2 }
0x1002   :  { %5042 = vmatpush3.bf16.msra.mxu1 %v5376_v27  ;;  %5074 = vmatpush3.bf16.msra.mxu0 %v5386_v47 }
0x1003   :  { %5043 = vmatprep.subr.bf16.mxu1 %v5627_v2  ;;  %5075 = vmatprep.subr.bf16.mxu0 %v5627_v2 }
0x1006   :  { %5044 = vmatpush3.bf16.msra.mxu1 %v5377_v28  ;;  %5076 = vmatpush3.bf16.msra.mxu0 %v5387_v48 }
0x1007   :  { %5049 = vmatprep.subr.bf16.mxu1 %v5627_v2  ;;  %5081 = vmatprep.subr.bf16.mxu0 %v5627_v2 }
0x108a   :  { %v2827_v18 = vpop.xlane.xlu1 %2826 }
0x108b   :  { %v2838_v38 = vmul.f32 %v6032_v57, %v2827_v18 }
0x108d   :  { %v2840_v62 = vadd.f32 %v2838_v38, %v6332_v36 }
0x108e   :  { %v2830_v32 = vpop.xlane.xlu1 %2829 }
0x108f   :  { %v2839_v35 = vmul.f32 %v6032_v57, %v2830_v32  ;;  %v2849_v4 = vadd.f32 %v6048_v5, %v2840_v62 }
0x1091   :  { %v2841_v41 = vadd.f32 %v2839_v35, %v6323_v37 }
0x1093   :  { %v2850_v57 = vadd.f32 %v6048_v5, %v2841_v41  ;;  %v5385_v5 = vld [vmem:[%s6555_s12 + $0x8] sm:$0xff]   ;;  %v5395_v41 = vld [vmem:[%s6555_s12 + $0x38] sm:$0xff]  }
0x1095   :  { %v3220_v44 = vpack.c.bf16 %v2850_v57, %v2849_v4  ;;  %v5396_v57 = vld [vmem:[%s6560_s25] sm:$0xff]   ;;  %v5397_v4 = vld [vmem:[%s6560_s25 + $0x8] sm:$0xff]  }
0x10cf   :  { %v5030_v31 = vpop.f32.mrb[42].mxu0  ;;  %v5035_v34 = vpop.f32.mrb[30].mxu1 }
0x10d0   :  { %v2917_v42 = vpop.f32.mrb[43].mxu0  ;;  %v2992_v29 = vpop.f32.mrb[31].mxu1 }
0x10d1   :  { %v3096_v16 = vpack.c.bf16 %v5030_v31, %v2917_v42  ;;  %v3161_v17 = vpack.c.bf16 %v5035_v34, %v2992_v29  ;;  %v5390_v31 = vld [vmem:[%s6555_s12 + $0x10] sm:$0xff]   ;;  %v4602_v34 = vld [vmem:[#allocation2] ss:$0 sm:$0xff] }
0x10d3   :  { %v5040_v7 = vpop.f32.mrb[44].mxu0  ;;  %5046 = vmatmul.mubr.msk.bf16.vlgmr.msra.gmra.mrb[32].mxu1 %vm925_vm9, %v3096_v16 }
0x10d4   :  { %v3070_v20 = vpop.f32.mrb[45].mxu0  ;;  %5050 = vmatpush3.bf16.msra.mxu1 %v5378_v6  ;;  %5053 = vmatprep.mubr.msk.bf16.mxu1 %vm5628_vm3, %v5627_v2 }
0x10d5   :  { %v3279_v30 = vpack.c.bf16 %v5040_v7, %v3070_v20  ;;  %5051 = vmatprep.subr.bf16.mxu1 %v5627_v2 }
0x10d8   :  { %5052 = vmatpush3.bf16.msra.mxu1 %v5379_v23 }
0x10d9   :  { %5057 = vmatprep.subr.bf16.mxu1 %v5627_v2 }
0x10df   :  { %5054 = vmatmul.mubr.msk.bf16.vlgmr.msra.gmra.mrb[32].mxu1 %vm925_vm9, %v3161_v17 }
0x10e0   :  { %5058 = vmatpush3.bf16.msra.mxu1 %v5380_v33  ;;  %5061 = vmatprep.mubr.msk.bf16.mxu1 %vm5628_vm3, %v5627_v2  ;;  %v5393_v33 = vld [vmem:[%s6555_s12 + $0x28] sm:$0xff]  }
0x10e1   :  { %5059 = vmatprep.subr.bf16.mxu1 %v5627_v2 }
0x10e4   :  { %5060 = vmatpush3.bf16.msra.mxu1 %v5381_v39 }
0x10e5   :  { %5065 = vmatprep.subr.bf16.mxu1 %v5627_v2 }
0x10eb   :  { %5062 = vmatmul.mubr.msk.bf16.vlgmr.msra.gmra.mrb[32].mxu1 %vm925_vm9, %v3220_v44 }
0x10ec   :  { %5066 = vmatpush3.bf16.msra.mxu1 %v5382_v43  ;;  %5069 = vmatprep.mubr.msk.bf16.mxu1 %vm5628_vm3, %v5627_v2  ;;  %v4613_v43 = vld [vmem:[#allocation5] ss:$0 sm:$0xff] }
0x10ed   :  { %5067 = vmatprep.subr.bf16.mxu1 %v5627_v2 }
0x10f0   :  { %5068 = vmatpush3.bf16.msra.mxu1 %v5383_v63 }
0x10f1   :  { %5108 = vmatprep.subr.bf16.mxu1 %v5627_v2 }
0x10f7   :  { %5070 = vmatmul.mubr.msk.bf16.vlgmr.msra.gmra.mrb[32].mxu1 %vm925_vm9, %v3279_v30 }
0x10f8   :  { %5109 = vmatpush3.bf16.msra.mxu1 %v5384_v1  ;;  %5112 = vmatprep.mubr.msk.bf16.mxu1 %vm5628_vm3, %v5627_v2 }
0x10f9   :  { %5110 = vmatprep.subr.bf16.mxu1 %v5627_v2 }
0x10fc   :  { %5111 = vmatpush3.bf16.msra.mxu1 %v5385_v5 }
0x10fd   :  { %5116 = vmatprep.subr.bf16.mxu1 %v5627_v2 }
0x10ff   :  { %5113 = vmatmul.mubr.msk.bf16.vlgmr.msra.gmra.mrb[36].mxu1 %vm925_vm9, %v3705_v45 }
0x1100   :  { %5120 = vmatprep.mubr.msk.bf16.mxu1 %vm5628_vm3, %v5627_v2  ;;  %5117 = vmatpush3.bf16.msra.mxu1 %v5390_v31 }
0x1101   :  { %5118 = vmatprep.subr.bf16.mxu1 %v5627_v2 }
0x11ca   :  { %v3329_v51 = vpop.f32.mrb[32].mxu1 }
0x11cb   :  { %v5201_v52 = vadd.f32 %v4588_v49, %v3329_v51  ;;  %v5071_v53 = vpop.f32.mrb[33].mxu1  ;;  %v5399_v51 = vld [vmem:[%s6561_s29 + $0x8] sm:$0xff]  }
0x11cc   :  { %v3332_v54 = vpop.f32.mrb[34].mxu1 }
0x11cd   :  { %v5202_v55 = vadd.f32 %v4588_v49, %v3332_v54  ;;  %v5072_v56 = vpop.f32.mrb[35].mxu1  ;;  %v3338_v58 = vmax.f32 %v5201_v52, 0.0  ;;  %v5398_v49 = vld [vmem:[%s6561_s29] sm:$0xff]  }
0x11ce   :  { %v4623_v52 = vld [vmem:[#allocation7] ss:$0 sm:$0xff] }
0x11cf   :  { %v3339_v59 = vmax.f32 %v5202_v55, 0.0 }
0x11d1   :  { %v3340_v60 = vpack.c.bf16 %v3339_v59, %v3338_v58 }
0x11d3   :  { %5078 = vmatmul.mubr.msk.bf16.vlgmr.msra.gmra.mrb[48].mxu0 %vm925_vm9, %v3340_v60 }
0x11d4   :  { %5085 = vmatprep.mubr.msk.bf16.mxu0 %vm5628_vm3, %v5627_v2  ;;  %5082 = vmatpush3.bf16.msra.mxu0 %v5388_v24  ;;  %v5400_v24 = vld [vmem:[%s6549_s1] sm:$0xff]  }
0x11d5   :  { %5083 = vmatprep.subr.bf16.mxu0 %v5627_v2 }
0x11d8   :  { %5084 = vmatpush3.bf16.msra.mxu0 %v5389_v61  ;;  %v5401_v61 = vld [vmem:[%s6549_s1 + $0x8] sm:$0xff]  }
0x11d9   :  { %5191 = vmatprep.subr.bf16.mxu0 %v5629_v3 }
0x12a6   :  { %v3401_v14 = vpop.f32.mrb[48].mxu0 }
0x12a7   :  { %v3402_v19 = vadd.f32 %v4598_v0, %v3401_v14  ;;  %v5079_v12 = vpop.f32.mrb[49].mxu0 }
0x12a8   :  { %v3404_v15 = vpop.f32.mrb[50].mxu0 }
0x12a9   :  { %v3405_v21 = vadd.f32 %v4598_v0, %v3404_v15  ;;  %v5080_v22 = vpop.f32.mrb[51].mxu0  ;;  %v3408_v26 = vmax.f32 %v3402_v19, 0.0  ;;  %v4627_v0 = vld [vmem:[#allocation8] ss:$0 sm:$0xff] }
0x12ab   :  { %v3409_v27 = vmax.f32 %v3405_v21, 0.0 }
0x12ad   :  { %v3410_v28 = vpack.c.bf16 %v3409_v27, %v3408_v26  ;;  %v5402_v27 = vld [vmem:[%s6550_s2] sm:$0xff]  }
0x12af   :  { %5086 = vmatmul.mubr.msk.bf16.vlgmr.msra.gmra.mrb[52].mxu0 %vm925_vm9, %v3410_v28  ;;  %v5403_v28 = vld [vmem:[%s6550_s2 + $0x8] sm:$0xff]  }
0x12b0   :  { %5093 = vmatprep.mubr.msk.f32.mxu0 %vm5628_vm3, %v5627_v2 }
0x1382   :  { %v3471_v42 = vpop.f32.mrb[52].mxu0 }
0x1383   :  { %v3472_v29 = vadd.f32 %v4602_v34, %v3471_v42  ;;  %v5087_v6 = vpop.f32.mrb[53].mxu0 }
0x1384   :  { %v3474_v16 = vpop.f32.mrb[54].mxu0 }
0x1385   :  { %v4077_v17 = vadd.f32 %v3472_v29, %v6332_v36  ;;  %v3475_v7 = vadd.f32 %v4602_v34, %v3474_v16  ;;  %v5088_v18 = vpop.f32.mrb[55].mxu0  ;;  %v5394_v36 = vld [vmem:[%s6555_s12 + $0x30] sm:$0xff]  }
0x1387   :  { %4362 = vst.msk [vmem:[#allocation11] sm:$0xff] %vm925_vm9, %v4077_v17  ;;  %v5192_v20 = vpack.c.bf16 %v3475_v7, %v3472_v29  ;;  %v4078_v23 = vadd.f32 %v3475_v7, %v6323_v37 }
0x1389   :  { %4363 = vst.msk [vmem:[#allocation11 + $0x8] sm:$0xff] %vm925_vm9, %v4078_v23  ;;  %5193 = vmatpush3.bf16.msra.mxu0 %v5192_v20 }
0x138a   :  { %5194 = vmatprep.subr.bf16.mxu0 %v5629_v3  ;;  %v5392_v3 = vld [vmem:[%s6555_s12 + $0x20] sm:$0xff]  }
0x138c   :  { %5094 = vmatmul.mubr.msk.f32.vlgmr.msra.gmra.mrb[46].mxu0 %vm1295_vm11, %v5930_v8  ;;  %v5391_v8 = vld [vmem:[%s6555_s12 + $0x18] sm:$0xff]  }
0x138d   :  { %5196 = vmatpush3.bf16.msra.mxu0 %v5192_v20  ;;  %5100 = vmatprep.mubr.msk.f32.mxu0 %vm5628_vm3, %v5627_v2 }
0x138e   :  { %5103 = vmatprep.subr.mxu0 %v5627_v2  ;;  %5119 = vmatpush3.bf16.msra.mxu1 %v5391_v8 }
0x138f   :  { %5124 = vmatprep.subr.bf16.mxu1 %v5627_v2 }
0x1390   :  { %5101 = vmatmul.mubr.msk.f32.vlgmr.msra.gmra.mrb[56].mxu0 %vm1295_vm11, %v5933_v9 }
0x1391   :  { %5104 = vmatpush3.msk.msra.mxu0 %vm816_vm8, %v6238_v13  ;;  %5105 = vmatprep.mubr.msk.f32.mxu0 %vm5628_vm3, %v5627_v2 }
0x1392   :  { %5140 = vmatprep.subr.bf16.mxu0 %v5627_v2 }
0x1394   :  { %5106 = vmatmul.mubr.msk.f32.vlgmr.msra.gmra.mrb[58].mxu0 %vm809_vm7, %v6119_v10 }
0x1395   :  { %5144 = vmatprep.mubr.msk.bf16.mxu0 %vm5628_vm3, %v5627_v2  ;;  %5141 = vmatpush3.bf16.msra.mxu0 %v5396_v57 }
0x1396   :  { %5142 = vmatprep.subr.bf16.mxu0 %v5627_v2 }
0x1399   :  { %5143 = vmatpush3.bf16.msra.mxu0 %v5397_v4 }
0x139a   :  { %5148 = vmatprep.subr.bf16.mxu0 %v5627_v2 }
0x145f   :  { %v3544_v9 = vpop.f32.mrb[46].mxu0 }
0x1460   :  { %v3768_v30 = vpack.c.bf16 %v3544_v9, %v3544_v9  ;;  %v5095_v13 = vpop.f32.mrb[47].mxu0 }
0x1462   :  { %5121 = vmatmul.mubr.msk.bf16.vlgmr.msra.gmra.mrb[36].mxu1 %vm925_vm9, %v3768_v30 }
0x1463   :  { %v3614_v32 = vpop.f32.mrb[56].mxu0  ;;  %5125 = vmatpush3.bf16.msra.mxu1 %v5392_v3  ;;  %5128 = vmatprep.mubr.msk.bf16.mxu1 %vm5628_vm3, %v5627_v2 }
0x1464   :  { %v5102_v35 = vpop.f32.mrb[57].mxu0  ;;  %5126 = vmatprep.subr.bf16.mxu1 %v5627_v2  ;;  %v3825_v39 = vpack.c.bf16 %v3614_v32, %v3614_v32 }
0x1467   :  { %v3684_v37 = vpop.f32.mrb[58].mxu0  ;;  %5127 = vmatpush3.bf16.msra.mxu1 %v5393_v33 }
0x1468   :  { %v5107_v38 = vpop.f32.mrb[59].mxu0  ;;  %5132 = vmatprep.subr.bf16.mxu1 %v5627_v2  ;;  %v3882_v62 = vpack.c.bf16 %v3684_v37, %v3684_v37 }
0x146e   :  { %5129 = vmatmul.mubr.msk.bf16.vlgmr.msra.gmra.mrb[36].mxu1 %vm925_vm9, %v3825_v39 }
0x146f   :  { %5133 = vmatpush3.bf16.msra.mxu1 %v5394_v36  ;;  %5136 = vmatprep.mubr.msk.bf16.mxu1 %vm5628_vm3, %v5627_v2 }
0x1470   :  { %5134 = vmatprep.subr.bf16.mxu1 %v5627_v2 }
0x1473   :  { %5135 = vmatpush3.bf16.msra.mxu1 %v5395_v41 }
0x1474   :  { %5172 = vmatprep.subr.mxu1 %v5627_v2 }
0x147a   :  { %5137 = vmatmul.mubr.msk.bf16.vlgmr.msra.gmra.mrb[36].mxu1 %vm925_vm9, %v3882_v62 }
0x147b   :  { %5174 = vmatprep.mubr.msk.f32.mxu1 %vm5628_vm3, %v5627_v2 }
0x154d   :  { %v3932_v44 = vpop.f32.mrb[36].mxu1 }
0x154e   :  { %v5203_v63 = vadd.f32 %v4613_v43, %v3932_v44  ;;  %v5138_v1 = vpop.f32.mrb[37].mxu1 }
0x154f   :  { %v3935_v5 = vpop.f32.mrb[38].mxu1 }
0x1550   :  { %v3939_v45 = vmax.f32 %v5203_v63, 0.0  ;;  %v5139_v47 = vpop.f32.mrb[39].mxu1 }
0x1552   :  { %v3940_v48 = vpack.c.bf16 %v3939_v45, %v3939_v45 }
0x1554   :  { %5145 = vmatmul.mubr.msk.bf16.vlgmr.msra.gmra.mrb[60].mxu0 %vm925_vm9, %v3940_v48 }
0x1555   :  { %5152 = vmatprep.mubr.msk.bf16.mxu0 %vm5628_vm3, %v5627_v2  ;;  %5149 = vmatpush3.bf16.msra.mxu0 %v5398_v49 }
0x1556   :  { %5150 = vmatprep.subr.bf16.mxu0 %v5627_v2 }
0x1559   :  { %5151 = vmatpush3.bf16.msra.mxu0 %v5399_v51 }
0x155a   :  { %5156 = vmatprep.subr.bf16.mxu0 %v5627_v2 }
0x1627   :  { %v4001_v53 = vpop.f32.mrb[60].mxu0 }
0x1628   :  { %v4002_v54 = vadd.f32 %v4623_v52, %v4001_v53  ;;  %v5146_v55 = vpop.f32.mrb[61].mxu0 }
0x1629   :  { %v4004_v56 = vpop.f32.mrb[62].mxu0 }
0x162a   :  { %v4007_v58 = vmax.f32 %v4002_v54, 0.0  ;;  %v5147_v59 = vpop.f32.mrb[63].mxu0 }
0x162c   :  { %v4008_v60 = vpack.c.bf16 %v4007_v58, %v4007_v58 }
0x162e   :  { %5153 = vmatmul.mubr.msk.bf16.vlgmr.msra.gmra.mrb[64].mxu0 %vm925_vm9, %v4008_v60 }
0x162f   :  { %5160 = vmatprep.mubr.msk.bf16.mxu0 %vm5628_vm3, %v5627_v2  ;;  %5157 = vmatpush3.bf16.msra.mxu0 %v5400_v24 }
0x1630   :  { %5158 = vmatprep.subr.bf16.mxu0 %v5627_v2 }
0x1633   :  { %5159 = vmatpush3.bf16.msra.mxu0 %v5401_v61 }
0x1634   :  { %5164 = vmatprep.subr.bf16.mxu0 %v5627_v2 }
0x1701   :  { %v4069_v14 = vpop.f32.mrb[64].mxu0 }
0x1702   :  { %v4070_v19 = vadd.f32 %v4627_v0, %v4069_v14  ;;  %v5154_v12 = vpop.f32.mrb[65].mxu0 }
0x1703   :  { %v4072_v15 = vpop.f32.mrb[66].mxu0 }
0x1704   :  { %v4076_v21 = vadd.f32 %v4070_v19, %v6223_v11  ;;  %v5155_v22 = vpop.f32.mrb[67].mxu0 }
0x1706   :  { %v4084_v26 = vpack.c.bf16 %v4076_v21, %v4076_v21  ;;  %4361 = vst.msk [vmem:[#allocation10] sm:$0xff] %vm925_vm9, %v4076_v21 }
0x1708   :  { %5161 = vmatmul.mubr.msk.bf16.vlgmr.msra.gmra.mrb[68].mxu0 %vm925_vm9, %v4084_v26 }
0x1709   :  { %5168 = vmatprep.mubr.msk.bf16.mxu0 %vm5628_vm3, %v5627_v2  ;;  %5165 = vmatpush3.bf16.msra.mxu0 %v5402_v27 }
0x170a   :  { %5166 = vmatprep.subr.bf16.mxu0 %v5627_v2 }
0x170d   :  { %5167 = vmatpush3.bf16.msra.mxu0 %v5403_v28 }
0x170e   :  { %5177 = vmatprep.subr.mxu0 %v5627_v2 }
0x17db   :  { %v4134_v31 = vpop.f32.mrb[68].mxu0 }
0x17dc   :  { %v4146_v11 = vadd.f32 %v6243_v25, %v4134_v31  ;;  %v5162_v34 = vpop.f32.mrb[69].mxu0 }
0x17dd   :  { %v4137_v42 = vpop.f32.mrb[70].mxu0 }
0x17de   :  { %v4147_v29 = vmax.f32 %v4146_v11, 0.0  ;;  %v5163_v6 = vpop.f32.mrb[71].mxu0 }
0x17e0   :  { %v4148_v16 = vpack.c.bf16 %v4147_v29, %v4147_v29 }
0x17e2   :  { %5169 = vmatmul.mubr.msk.bf16.vlgmr.msra.gmra.mrb[72].mxu0 %vm925_vm9, %v4148_v16 }
0x17e3   :  { %5179 = vmatprep.mubr.msk.f32.mxu0 %vm5628_vm3, %v5627_v2 }
0x18b5   :  { %v4209_v17 = vpop.f32.mrb[72].mxu0 }
0x18b6   :  { %v6449_v7 = vadd.f32 %v6251_v40, %v4209_v17  ;;  %v5170_v18 = vpop.f32.mrb[73].mxu0 }
0x18b7   :  { %v4212_v20 = vpop.f32.mrb[74].mxu0 }
0x18b8   :  { %v5171_v23 = vpop.f32.mrb[75].mxu0  ;;  %5173 = vmatpush3.msra.mxu1 %v6449_v7 }
0x18b9   :  { %5175 = vmatmul.mubr.msk.f32.vlgmr.msra.gmra.mrb[40].mxu1 %vm537_vm6, %v6090_v46 }
0x198c   :  { %v4281_v25 = vpop.f32.mrb[40].mxu1 }
0x198d   :  { %v4285_v8 = vmul.f32 %v6259_v50, %v4281_v25  ;;  %v5176_v9 = vpop.f32.mrb[41].mxu1 }
0x198f   :  { %5178 = vmatpush3.msk.msra.mxu0 %vm816_vm8, %v4285_v8 }
0x1990   :  { %5180 = vmatmul.mubr.msk.f32.vlgmr.msra.gmra.mrb[76].mxu0 %vm809_vm7, %v6119_v10 }
0x1991   :  { %5505 = shalt.err (!%p5502_p8)
}
0x1992   :  { %s5506_s0 = scalar_lea.hbm %s5888_s30, 256 }
0x1993   :  { %p5507_p9 = scmp.ne.s32.totalorder %s5888_s30, %s5506_s0  ;;  %p5510_p10 = scmp.lt.u32.totalorder %s5506_s0, %s5888_s30 }
0x1995   :  { %p5512_p11 = pnand %p5510_p10, %p5507_p9 }
0x1997   :  { %5515 = shalt.err (!%p5512_p11)
}
0x1998   :  { %s5632_s11 = smov 128   ;;  %s5633_s15 = smov 8  }
0x1999   :  { %4387 = dma.vmem_to_hbm [thread:$0]  %s4382_s8, 256, %s5888_s30, [#allocation12], %s5632_s11, %s5632_s11, %s5633_s15  }
0x199a   :  { %s5516_s16 = scalar_lea.vmem %s4373_s24, 128  ;;  %p5521_p13 = scmp.lt.s32.totalorder %s4373_s24, %s4373_s24 }
0x199b   :  { %p5517_p12 = scmp.ne.s32.totalorder %s4373_s24, %s5516_s16  ;;  %p5522_p0 = scmp.lt.s32.totalorder %s5516_s16, %s5516_s16 }
0x199d   :  { %p5523_p1 = por %p5522_p0, %p5521_p13 }
0x199f   :  { %p5524_p2 = pnand %p5523_p1, %p5517_p12 }
0x19a1   :  { %5527 = shalt.err (!%p5524_p2)
}
0x19a2   :  { %s6562_s18 = sld [smem:[#allocation53_spill]] }
0x19a8   :  { %s5528_s22 = scalar_lea.hbm %s6562_s18, 128 }
0x19a9   :  { %p5529_p3 = scmp.ne.s32.totalorder %s6562_s18, %s5528_s22  ;;  %p5532_p4 = scmp.lt.u32.totalorder %s5528_s22, %s6562_s18 }
0x19ab   :  { %p5534_p5 = pnand %p5532_p4, %p5529_p3 }
0x19ad   :  { %5537 = shalt.err (!%p5534_p5)
}
0x19ae   :  { %4375 = dma.vmem_to_hbm [thread:$0]  %s4373_s24, 128, %s6562_s18, [#allocation4]  }
0x19af   :  { %s5634_s20 = smov [#allocation13]  }
0x19b0   :  { %s4394_s30 = sshll.u32 %s5634_s20, 4  ;;  %s4395_s30 = int_to_ptr.vmem [resolvable:$true] %s4394_s30 }
0x19b1   :  { %s5538_s23 = scalar_lea.vmem %s4395_s30, 32  ;;  %p5543_p7 = scmp.lt.s32.totalorder %s4395_s30, %s4395_s30 }
0x19b2   :  { %p5539_p6 = scmp.ne.s32.totalorder %s4395_s30, %s5538_s23  ;;  %p5544_p8 = scmp.lt.s32.totalorder %s5538_s23, %s5538_s23 }
0x19b4   :  { %p5545_p9 = por %p5544_p8, %p5543_p7 }
0x19b6   :  { %p5546_p10 = pnand %p5545_p9, %p5539_p6 }
0x19b8   :  { %5549 = shalt.err (!%p5546_p10)
}
0x19b9   :  { %s5550_s26 = scalar_lea.hbm %s5893_s13, 32 }
0x19ba   :  { %p5551_p11 = scmp.ne.s32.totalorder %s5893_s13, %s5550_s26  ;;  %p5554_p12 = scmp.lt.u32.totalorder %s5550_s26, %s5893_s13 }
0x19bc   :  { %p5556_p13 = pnand %p5554_p12, %p5551_p11 }
0x19be   :  { %5559 = shalt.err (!%p5556_p13)
}
0x19bf   :  { %4397 = dma.vmem_to_hbm [thread:$0]  %s4395_s30, 32, %s5893_s13, [#allocation12]  }
0x1a63   :  { %v4355_v2 = vpop.f32.mrb[76].mxu0 }
0x1a64   :  { %v4359_v46 = vsub.f32 %v6449_v7, %v4355_v2  ;;  %v5181_v10 = vpop.f32.mrb[77].mxu0 }
0x1a66   :  { %4360 = vst.msk [vmem:[%s5903_s27] sm:$0xff] %vm448_vm5, %v4359_v46 }
0x1a67   :  { %5566 = dma.done.wait [#allocation4], 128  }
0x1a68   :  { %5567 = vsyncadd [#allocation4], 4294967168 }
0x1a69   :  { %5568 = dma.done.wait [#allocation12], 288  }
0x1a6a   :  { %5569 = vsyncadd [#allocation12], 4294967008 }
0x1a6b   :  { %4415 = vsyncpa [#allocation3], 1 }
0x1a6c   :  { %4416 = vsyncpa [#allocation6], 1 }
0x1a6d   :  { %4417 = vsyncpa [#allocation9], 1 }
0x1a6e   :  { %4418 = vsyncpa [#allocation4], 1 }
0x1a6f   :  { %4419 = vsyncpa [#allocation12], 1 }

</bundles_post_ra>
